<compile_context>
chip_gen: v7x
topology: tpu7x:2x2x1
jax: 0.10.0
libtpu: 0.0.40
codegen_flags: <defaults>
</compile_context>

<pallas_src>
import functools

import jax
import jax.numpy as jnp
import numpy as np
from jax.experimental import pallas as pl
from jax.experimental.pallas import tpu as pltpu

EPS = 1e-5          # nn.BatchNorm1d eps
NEG_SLOPE = 0.01    # F.leaky_relu default negative_slope
LANE = 128
NEG_BIG = -1e30     # additive mask for non-edges (exp underflows to exact 0)


# ------------------------------ small helpers ------------------------------

def _round_up(x, m):
    return (x + m - 1) // m * m


def _pad2(a, rows, cols):
    """Zero-pad a 2-D array to (rows, cols); zero padding keeps padded lanes exact 0."""
    a = np.asarray(a, np.float32)
    r, c = a.shape
    out = np.zeros((rows, cols), np.float32)
    out[:r, :c] = a
    return jnp.asarray(out)


def _att_weight_np(W_src, att_src, att_dst, heads, hidden):
    """W_att[k, h] = sum_c W_src[k, h*C+c] * att_{src,dst}[h, c]  -> [hidden, 2H].

    x @ W_att == ((x @ W_src).view(N,H,C) * att).sum(-1): the PyTorch alpha math,
    re-associated so it folds into the W_src matmul.
    """
    W = np.asarray(W_src, np.float32).reshape(hidden, heads, hidden)
    w_s = np.einsum("khc,hc->kh", W, np.asarray(att_src, np.float32))
    w_d = np.einsum("khc,hc->kh", W, np.asarray(att_dst, np.float32))
    return np.concatenate([w_s, w_d], axis=1)


def _pack_wcomb(W_src, att_src, att_dst, heads, hidden, HP, CP, AP):
    """[HP, heads*CP + AP]: per-head 128-aligned W_src blocks + folded alpha selectors."""
    W = np.asarray(W_src, np.float32)
    comb = np.zeros((HP, heads * CP + AP), np.float32)
    for h in range(heads):
        comb[:hidden, h * CP:h * CP + hidden] = W[:, h * hidden:(h + 1) * hidden]
    comb[:hidden, heads * CP:heads * CP + 2 * heads] = _att_weight_np(
        W, att_src, att_dst, heads, hidden)
    return jnp.asarray(comb)


def _pad_head_blocks(vec, heads, hidden, CP):
    """[1, heads*hidden] vector -> [1, heads*CP] with each head on its own 128 block."""
    v = np.asarray(vec, np.float32).reshape(-1)
    out = np.zeros((1, heads * CP), np.float32)
    for h in range(heads):
        out[0, h * CP:h * CP + hidden] = v[h * hidden:(h + 1) * hidden]
    return jnp.asarray(out)


def _pad_wout(W_out, heads, hidden, CP, HP):
    """[heads*hidden, hidden] -> [heads*CP, HP]; padded rows/cols are exact 0."""
    W = np.asarray(W_out, np.float32)
    out = np.zeros((heads * CP, HP), np.float32)
    for h in range(heads):
        out[h * CP:h * CP + hidden, :hidden] = W[h * hidden:(h + 1) * hidden]
    return jnp.asarray(out)


def _batchnorm(y, gamma, beta):
    # Training-mode BatchNorm1d: biased batch statistics over the node axis.
    # The node axis is never padded; padded feature columns are all-zero and
    # have gamma = beta = 0, so they stay exactly 0.
    mean = jnp.mean(y, axis=0, keepdims=True)
    var = jnp.mean((y - mean) ** 2, axis=0, keepdims=True)
    return gamma * (y - mean) * jax.lax.rsqrt(var + EPS) + beta


# --------------------------------- kernel ----------------------------------

def lattice_vae_encode_kernel(
        # inputs
        x_ref, emb_w_ref, emb_b_ref, emb_g_ref, emb_bt_ref,
        adj_ref, w_ref, batch_ref,
        wcomb_ref, bias_ref, gamma_ref, beta_ref, wout_ref,
        wmu_ref, bmu_ref, wvar_ref, bvar_ref, epsg_ref, epsn_ref,
        # outputs
        xout_ref, pool_ref, mu_ref, logvar_ref, z_ref, nz_ref, kld_ref,
        *, heads, hidden, layers, num_graphs, cp):
    f32 = jnp.float32
    bf16 = jnp.bfloat16
    base = heads * cp                  # lane offset of the folded alpha columns

    # ---- atom_embedding (MLPLayer): Linear -> BatchNorm1d -> ReLU ----
    y = jnp.dot(x_ref[...].astype(bf16), emb_w_ref[...],
                preferred_element_type=f32) + emb_b_ref[...]
    x = jnp.maximum(_batchnorm(y, emb_g_ref[...], emb_bt_ref[...]), 0.0)   # [N, HP]

    adj_mask = adj_ref[...] > 0        # [N_dst, N_src] bool, self loops on the diag
    w_row = w_ref[...]                 # [1, N] atom weight at the source node

    # ---- L x RConv (GAT-style attention, dense adjacency) ----
    for l in range(layers):
        x_b = x.astype(bf16)
        # One fused MXU pass: cols [h*cp : h*cp+C] = head-h xp (lane-aligned block),
        # cols [base : base+2H] = alpha_src | alpha_dst.
        xpa = jnp.dot(x_b, wcomb_ref[l], preferred_element_type=f32)       # [N, H*cp+AP]
        xpa_b = xpa.astype(bf16)
        a_src_t = xpa[:, base:base + heads].T                              # [H, N] tiny relayout

        head_outs = []
        for h in range(heads):
            # scores[dst, src] = alpha_dst[dst] + alpha_src[src]
            a_dst = xpa[:, base + heads + h:base + heads + h + 1]          # [N, 1]
            sc = a_dst + a_src_t[h:h + 1, :]                               # [N, N]
            sc = jnp.where(sc > 0, sc, NEG_SLOPE * sc)                     # leaky_relu
            sc = sc * w_row                                                # *= weight_j
            sc = jnp.where(adj_mask, sc, NEG_BIG)                          # mask BEFORE max
            m = jnp.max(sc, axis=1, keepdims=True)
            p = jnp.exp(sc - m)                                            # exact 0 off-edge
            att = (p / jnp.sum(p, axis=1, keepdims=True)).astype(bf16)     # exact divide
            # 128-wide output per head (cols >= hidden of this block are exact 0).
            head_outs.append(jnp.dot(att, xpa_b[:, h * cp:(h + 1) * cp],
                                     preferred_element_type=f32))          # [N, cp]

        out = jnp.concatenate(head_outs, axis=-1) + bias_ref[l]            # [N, H*cp]
        out = _batchnorm(out, gamma_ref[l], beta_ref[l])                   # bn_nodes
        out = jnp.dot(out.astype(bf16), wout_ref[l],
                      preferred_element_type=f32)                          # lin_out [N, HP]
        x = out + x                                                        # residual

    xout_ref[...] = x

    # ---- global_add_pool: exact f32 masked segment sums ----
    batch_col = batch_ref[...]                                             # [N, 1] int32
    rows = []
    for g in range(num_graphs):
        rows.append(jnp.sum(jnp.where(batch_col == g, x, 0.0),
                            axis=0, keepdims=True))                        # [1, HP]
    readout = jnp.concatenate(rows, axis=0)                                # [G, HP]
    pool_ref[...] = readout

    # ---- VAE heads: fc_mu / fc_var, reparameterize, KLD ----
    r_b = readout.astype(bf16)
    mu = jnp.dot(r_b, wmu_ref[...], preferred_element_type=f32) + bmu_ref[...]
    logvar = jnp.dot(r_b, wvar_ref[...], preferred_element_type=f32) + bvar_ref[...]
    mu_ref[...] = mu
    logvar_ref[...] = logvar
    z_ref[...] = epsg_ref[...] * jnp.exp(0.5 * logvar) + mu

    x_b2 = x.astype(bf16)
    n_mu = jnp.dot(x_b2, wmu_ref[...], preferred_element_type=f32) + bmu_ref[...]
    n_logvar = jnp.dot(x_b2, wvar_ref[...], preferred_element_type=f32) + bvar_ref[...]
    nz_ref[...] = epsn_ref[...] * jnp.exp(0.5 * n_logvar) + n_mu

    # kld = 0.001 * mean_g(-0.5 * sum_d(1 + logvar - mu^2 - exp(logvar)))
    # padded lanes have mu = logvar = 0 -> they contribute exactly 0 to the sum.
    t = 1.0 + logvar - mu * mu - jnp.exp(logvar)
    per_g = jnp.sum(t, axis=1, keepdims=True)                              # [G, 1]
    kld = -0.5e-3 * jnp.mean(per_g, axis=0, keepdims=True)                 # [1, 1]
    kld_ref[...] = jnp.broadcast_to(kld, kld_ref.shape)                    # lane-dense store


# ------------------------------ python wrapper ------------------------------

def lattice_vae_encode(params, node_features, adj, atom_w, batch,
                       eps_g, eps_n, *, heads, hidden, num_graphs):
    n, fin = node_features.shape
    layers = len(params["layers"])
    FINP = _round_up(fin, LANE)
    HP = _round_up(hidden, LANE)
    CP = _round_up(hidden, LANE)        # per-head lane-aligned block width
    AP = _round_up(2 * heads, LANE)     # folded alpha-selector block width
    f32, bf16 = jnp.float32, jnp.bfloat16

    # ---- pad / pack operands (matmul weights pre-cast to bf16; mask in bf16) ----
    x_p = _pad2(node_features, n, FINP)
    emb_w = _pad2(params["emb_W"], FINP, HP).astype(bf16)
    emb_b = _pad2(params["emb_b"], 1, HP)
    emb_g = _pad2(params["emb_gamma"], 1, HP)
    emb_bt = _pad2(params["emb_beta"], 1, HP)

    wcomb = jnp.stack([_pack_wcomb(lp["W_src"], lp["att_src"], lp["att_dst"],
                                   heads, hidden, HP, CP, AP)
                       for lp in params["layers"]]).astype(bf16)
    bias = jnp.stack([_pad_head_blocks(lp["bias"], heads, hidden, CP)
                      for lp in params["layers"]])
    gamma = jnp.stack([_pad_head_blocks(lp["gamma"], heads, hidden, CP)
                       for lp in params["layers"]])
    beta = jnp.stack([_pad_head_blocks(lp["beta"], heads, hidden, CP)
                      for lp in params["layers"]])
    wout = jnp.stack([_pad_wout(lp["W_out"], heads, hidden, CP, HP)
                      for lp in params["layers"]]).astype(bf16)

    wmu = _pad2(params["W_mu"], HP, HP).astype(bf16)
    bmu = _pad2(params["b_mu"], 1, HP)
    wvar = _pad2(params["W_var"], HP, HP).astype(bf16)
    bvar = _pad2(params["b_var"], 1, HP)

    eps_g_p = _pad2(eps_g, num_graphs, HP)
    eps_n_p = _pad2(eps_n, n, HP)

    adj_b = adj.astype(bf16)                           # 0/1 exact in bf16, half the bytes
    w_row = atom_w.astype(f32).reshape(1, n)
    batch_col = batch.astype(jnp.int32).reshape(n, 1)

    kernel = functools.partial(lattice_vae_encode_kernel,
                               heads=heads, hidden=hidden, layers=layers,
                               num_graphs=num_graphs, cp=CP)

    vmem = pltpu.MemorySpace.VMEM
    out_shape = (
        jax.ShapeDtypeStruct((n, HP), f32),            # node embeddings (FormulaNet x)
        jax.ShapeDtypeStruct((num_graphs, HP), f32),   # global_add_pool readout
        jax.ShapeDtypeStruct((num_graphs, HP), f32),   # mu
        jax.ShapeDtypeStruct((num_graphs, HP), f32),   # log_var
        jax.ShapeDtypeStruct((num_graphs, HP), f32),   # z
        jax.ShapeDtypeStruct((n, HP), f32),            # n_z
        jax.ShapeDtypeStruct((1, LANE), f32),          # kld, broadcast over lanes
    )
    args = (x_p, emb_w, emb_b, emb_g, emb_bt,
            adj_b, w_row, batch_col,
            wcomb, bias, gamma, beta, wout,
            wmu, bmu, wvar, bvar, eps_g_p, eps_n_p)

    # VMEM limit sized from the actual resident footprint (everything is resident;
    # no grid -> no double-buffering of streamed blocks).
    footprint = sum(int(np.prod(a.shape)) * jnp.dtype(a.dtype).itemsize for a in args)
    footprint += sum(int(np.prod(s.shape)) * jnp.dtype(s.dtype).itemsize for s in out_shape)
    vmem_limit = int(min(max(4 * footprint, 16 << 20), 96 << 20))

    outs = pl.pallas_call(
        kernel,
        out_shape=out_shape,
        in_specs=[pl.BlockSpec(memory_space=vmem) for _ in args],
        out_specs=tuple(pl.BlockSpec(memory_space=vmem) for _ in out_shape),
        compiler_params=pltpu.CompilerParams(vmem_limit_bytes=vmem_limit),
    )(*args)

    x_nodes, readout, mu, logvar, z, n_z, kld = outs
    return (x_nodes[:, :hidden], readout[:, :hidden], mu[:, :hidden],
            logvar[:, :hidden], z[:, :hidden], n_z[:, :hidden], kld[0, 0])


# ---------------------------------- params ----------------------------------

def init_params(key, fin, hidden, heads, layers):
    ks = jax.random.split(key, 6 + 4 * layers)
    hc = heads * hidden
    p = {
        "emb_W": jax.random.normal(ks[0], (fin, hidden), jnp.float32) / np.sqrt(fin),
        "emb_b": jax.random.normal(ks[1], (1, hidden), jnp.float32) * 0.1,
        "emb_gamma": jnp.ones((1, hidden), jnp.float32),
        "emb_beta": jnp.zeros((1, hidden), jnp.float32),
        "W_mu": jax.random.normal(ks[2], (hidden, hidden), jnp.float32) / np.sqrt(hidden),
        "b_mu": jax.random.normal(ks[3], (1, hidden), jnp.float32) * 0.1,
        "W_var": jax.random.normal(ks[4], (hidden, hidden), jnp.float32) * (0.1 / np.sqrt(hidden)),
        "b_var": jax.random.normal(ks[5], (1, hidden), jnp.float32) * 0.01,
        "layers": [],
    }
    for l in range(layers):
        k0, k1, k2, k3 = ks[6 + 4 * l: 10 + 4 * l]
        p["layers"].append({
            "W_src": jax.random.normal(k0, (hidden, hc), jnp.float32) / np.sqrt(hidden),
            "att_src": jax.random.normal(k1, (heads, hidden), jnp.float32) / np.sqrt(hidden),
            "att_dst": jax.random.normal(k2, (heads, hidden), jnp.float32) / np.sqrt(hidden),
            "bias": jnp.zeros((1, hc), jnp.float32),       # torch.nn.init.zeros_
            "gamma": jnp.ones((1, hc), jnp.float32),
            "beta": jnp.zeros((1, hc), jnp.float32),
            "W_out": jax.random.normal(k3, (hc, hidden), jnp.float32) / np.sqrt(hc),
        })
    return p


# --------------------------- pure-JAX reference -----------------------------
# Implements the PyTorch forward math; matmul operands are cast to bf16 (f32
# accumulation) and alpha is computed through the re-associated (mathematically
# identical) folded selector so the comparison isolates structural correctness.

def _mm(a, b):
    return jnp.dot(a.astype(jnp.bfloat16), b.astype(jnp.bfloat16),
                   preferred_element_type=jnp.float32)


def ref_encode(params, x, adj, atom_w, batch, eps_g, eps_n, *, heads, hidden, num_graphs):
    w_row = atom_w.reshape(1, -1).astype(jnp.float32)
    adj_mask = adj > 0
    h = jnp.maximum(_batchnorm(_mm(x, params["emb_W"]) + params["emb_b"],
                               params["emb_gamma"], params["emb_beta"]), 0.0)
    for lp in params["layers"]:
        xp = _mm(h, lp["W_src"])
        w_att = jnp.asarray(_att_weight_np(lp["W_src"], lp["att_src"], lp["att_dst"],
                                           heads, hidden))
        a = _mm(h, w_att)                                   # [N, 2H]: alpha_src | alpha_dst
        outs = []
        for hd in range(heads):
            sc = a[:, heads + hd:heads + hd + 1] + a[:, hd][None, :]
            sc = jnp.where(sc > 0, sc, NEG_SLOPE * sc) * w_row
            sc = jnp.where(adj_mask, sc, NEG_BIG)
            p = jnp.exp(sc - jnp.max(sc, axis=1, keepdims=True))
            att = p / jnp.sum(p, axis=1, keepdims=True)
            outs.append(_mm(att, xp[:, hd * hidden:(hd + 1) * hidden]))
        out = jnp.concatenate(outs, axis=-1) + lp["bias"]
        out = _mm(_batchnorm(out, lp["gamma"], lp["beta"]), lp["W_out"])
        h = out + h
    readout = jnp.concatenate(
        [jnp.sum(jnp.where((batch == g)[:, None], h, 0.0), axis=0, keepdims=True)
         for g in range(num_graphs)], axis=0)
    mu = _mm(readout, params["W_mu"]) + params["b_mu"]
    logvar = _mm(readout, params["W_var"]) + params["b_var"]
    z = eps_g * jnp.exp(0.5 * logvar) + mu
    n_mu = _mm(h, params["W_mu"]) + params["b_mu"]
    n_logvar = _mm(h, params["W_var"]) + params["b_var"]
    n_z = eps_n * jnp.exp(0.5 * n_logvar) + n_mu
    kld = 1e-3 * jnp.mean(-0.5 * jnp.sum(1.0 + logvar - mu ** 2 - jnp.exp(logvar), axis=1))
    return h, readout, mu, logvar, z, n_z, kld


# ----------------------------------- main -----------------------------------

if __name__ == "__main__":
    N, FIN, HIDDEN, HEADS, LAYERS, G = 8, 16, 32, 2, 2, 2

    key = jax.random.PRNGKey(0)
    k_par, k_x, k_w, k_eg, k_en = jax.random.split(key, 5)

    params = init_params(k_par, FIN, HIDDEN, HEADS, LAYERS)

    node_features = jax.random.normal(k_x, (N, FIN), jnp.float32)
    atom_weights = jax.random.uniform(k_w, (N, 1), jnp.float32, 0.5, 1.5)
    batch = jnp.asarray(np.array([0, 0, 0, 0, 1, 1, 1, 1], np.int32))

    # reparameterization noise (explicit so kernel and reference agree)
    eps_g = jax.random.normal(k_eg, (G, HIDDEN), jnp.float32)
    eps_n = jax.random.normal(k_en, (N, HIDDEN), jnp.float32)

    # edge_index (src, dst) densified to adj[dst, src]; self loops removed then
    # re-added for every node (remove_self_loops + add_self_loops)
    edges = np.array([
        [0, 1], [1, 0], [1, 2], [2, 1], [2, 3], [3, 2], [0, 3], [3, 0],
        [4, 5], [5, 4], [5, 6], [6, 5], [6, 7], [7, 6], [4, 7], [7, 4],
        [2, 2],
    ], np.int32)
    adj_np = np.zeros((N, N), np.float32)
    for s, d in edges:
        if s != d:
            adj_np[d, s] = 1.0
    np.fill_diagonal(adj_np, 1.0)
    adj = jnp.asarray(adj_np)

    outs = lattice_vae_encode(params, node_features, adj, atom_weights, batch,
                              eps_g, eps_n, heads=HEADS, hidden=HIDDEN, num_graphs=G)
    outs = jax.block_until_ready(outs)

    refs = ref_encode(params, node_features, adj, atom_weights, batch,
                      eps_g, eps_n, heads=HEADS, hidden=HIDDEN, num_graphs=G)

    for name, got, want in zip(["node_x", "readout", "mu", "log_var", "z", "n_z", "kld"],
                               outs, refs):
        np.testing.assert_allclose(np.asarray(got), np.asarray(want),
                                   rtol=5e-2, atol=5e-2, err_msg=name)

    print("KERNEL_OK")
</pallas_src>

<mosaic_0001>
module attributes {stable_mosaic.version = 11 : i64} {
  func.func @lattice_vae_encode_kernel(%arg0: memref<8x128xf32, #tpu.memory_space<vmem>>, %arg1: memref<128x128xbf16, #tpu.memory_space<vmem>>, %arg2: memref<1x128xf32, #tpu.memory_space<vmem>>, %arg3: memref<1x128xf32, #tpu.memory_space<vmem>>, %arg4: memref<1x128xf32, #tpu.memory_space<vmem>>, %arg5: memref<8x8xbf16, #tpu.memory_space<vmem>>, %arg6: memref<1x8xf32, #tpu.memory_space<vmem>>, %arg7: memref<8x1xi32, #tpu.memory_space<vmem>>, %arg8: memref<2x128x384xbf16, #tpu.memory_space<vmem>>, %arg9: memref<2x1x256xf32, #tpu.memory_space<vmem>>, %arg10: memref<2x1x256xf32, #tpu.memory_space<vmem>>, %arg11: memref<2x1x256xf32, #tpu.memory_space<vmem>>, %arg12: memref<2x256x128xbf16, #tpu.memory_space<vmem>>, %arg13: memref<128x128xbf16, #tpu.memory_space<vmem>>, %arg14: memref<1x128xf32, #tpu.memory_space<vmem>>, %arg15: memref<128x128xbf16, #tpu.memory_space<vmem>>, %arg16: memref<1x128xf32, #tpu.memory_space<vmem>>, %arg17: memref<2x128xf32, #tpu.memory_space<vmem>>, %arg18: memref<8x128xf32, #tpu.memory_space<vmem>>, %arg19: memref<8x128xf32, #tpu.memory_space<vmem>>, %arg20: memref<2x128xf32, #tpu.memory_space<vmem>>, %arg21: memref<2x128xf32, #tpu.memory_space<vmem>>, %arg22: memref<2x128xf32, #tpu.memory_space<vmem>>, %arg23: memref<2x128xf32, #tpu.memory_space<vmem>>, %arg24: memref<8x128xf32, #tpu.memory_space<vmem>>, %arg25: memref<1x128xf32, #tpu.memory_space<vmem>>) attributes {dimension_semantics = [], scalar_prefetch = 0 : i64, scratch_operands = 0 : i64, tpu.core_type = #tpu.core_type<tc>} {
    %c0 = arith.constant 0 : index
    %c0_0 = arith.constant 0 : index
    %0 = vector.load %arg0[%c0, %c0_0] : memref<8x128xf32, #tpu.memory_space<vmem>>, vector<8x128xf32>
    %1 = arith.truncf %0 : vector<8x128xf32> to vector<8x128xbf16>
    %c0_1 = arith.constant 0 : index
    %c0_2 = arith.constant 0 : index
    %2 = vector.load %arg1[%c0_1, %c0_2] : memref<128x128xbf16, #tpu.memory_space<vmem>>, vector<128x128xbf16>
    %cst = arith.constant dense<0.000000e+00> : vector<8x128xf32>
    %3 = tpu.matmul %1, %2, %cst {dimension_numbers = #tpu.dot_dimension_numbers<[1], [0], [0], [1], [0, 0, 1, 1], [], []>} : vector<8x128xbf16>, vector<128x128xbf16>, vector<8x128xf32> -> vector<8x128xf32>
    %c0_3 = arith.constant 0 : index
    %c0_4 = arith.constant 0 : index
    %4 = vector.load %arg2[%c0_3, %c0_4] : memref<1x128xf32, #tpu.memory_space<vmem>>, vector<1x128xf32>
    %5 = vector.broadcast %4 : vector<1x128xf32> to vector<8x128xf32>
    %6 = arith.addf %3, %5 : vector<8x128xf32>
    %c0_5 = arith.constant 0 : index
    %c0_6 = arith.constant 0 : index
    %7 = vector.load %arg3[%c0_5, %c0_6] : memref<1x128xf32, #tpu.memory_space<vmem>>, vector<1x128xf32>
    %c0_7 = arith.constant 0 : index
    %c0_8 = arith.constant 0 : index
    %8 = vector.load %arg4[%c0_7, %c0_8] : memref<1x128xf32, #tpu.memory_space<vmem>>, vector<1x128xf32>
    %cst_9 = arith.constant dense<0.000000e+00> : vector<128xf32>
    %9 = vector.multi_reduction <add>, %6, %cst_9 [0] : vector<8x128xf32> to vector<128xf32>
    %10 = vector.shape_cast %9 : vector<128xf32> to vector<1x128xf32>
    %cst_10 = arith.constant 8.000000e+00 : f32
    %11 = vector.broadcast %cst_10 : f32 to vector<1x128xf32>
    %12 = arith.divf %10, %11 : vector<1x128xf32>
    %13 = vector.broadcast %12 : vector<1x128xf32> to vector<8x128xf32>
    %14 = arith.subf %6, %13 : vector<8x128xf32>
    %15 = arith.mulf %14, %14 : vector<8x128xf32>
    %cst_11 = arith.constant dense<0.000000e+00> : vector<128xf32>
    %16 = vector.multi_reduction <add>, %15, %cst_11 [0] : vector<8x128xf32> to vector<128xf32>
    %17 = vector.shape_cast %16 : vector<128xf32> to vector<1x128xf32>
    %cst_12 = arith.constant 8.000000e+00 : f32
    %18 = vector.broadcast %cst_12 : f32 to vector<1x128xf32>
    %19 = arith.divf %17, %18 : vector<1x128xf32>
    %20 = vector.broadcast %12 : vector<1x128xf32> to vector<8x128xf32>
    %21 = arith.subf %6, %20 : vector<8x128xf32>
    %22 = vector.broadcast %7 : vector<1x128xf32> to vector<8x128xf32>
    %23 = arith.mulf %22, %21 : vector<8x128xf32>
    %cst_13 = arith.constant 9.99999974E-6 : f32
    %24 = vector.broadcast %cst_13 : f32 to vector<1x128xf32>
    %25 = arith.addf %19, %24 : vector<1x128xf32>
    %26 = math.rsqrt %25 : vector<1x128xf32>
    %27 = vector.broadcast %26 : vector<1x128xf32> to vector<8x128xf32>
    %28 = arith.mulf %23, %27 : vector<8x128xf32>
    %29 = vector.broadcast %8 : vector<1x128xf32> to vector<8x128xf32>
    %30 = arith.addf %28, %29 : vector<8x128xf32>
    %cst_14 = arith.constant 0.000000e+00 : f32
    %31 = vector.broadcast %cst_14 : f32 to vector<8x128xf32>
    %32 = arith.maximumf %30, %31 : vector<8x128xf32>
    %c0_15 = arith.constant 0 : index
    %c0_16 = arith.constant 0 : index
    %33 = vector.load %arg5[%c0_15, %c0_16] : memref<8x8xbf16, #tpu.memory_space<vmem>>, vector<8x8xbf16>
    %cst_17 = arith.constant 0.000000e+00 : bf16
    %34 = vector.broadcast %cst_17 : bf16 to vector<8x8xbf16>
    %35 = arith.cmpf ogt, %33, %34 : vector<8x8xbf16>
    %c0_18 = arith.constant 0 : index
    %c0_19 = arith.constant 0 : index
    %36 = vector.load %arg6[%c0_18, %c0_19] : memref<1x8xf32, #tpu.memory_space<vmem>>, vector<1x8xf32>
    %37 = arith.truncf %32 : vector<8x128xf32> to vector<8x128xbf16>
    %c0_20 = arith.constant 0 : index
    %c0_21 = arith.constant 0 : index
    %c0_22 = arith.constant 0 : index
    %38 = vector.load %arg8[%c0_20, %c0_21, %c0_22] : memref<2x128x384xbf16, #tpu.memory_space<vmem>>, vector<1x128x384xbf16>
    %39 = vector.shape_cast %38 : vector<1x128x384xbf16> to vector<128x384xbf16>
    %cst_23 = arith.constant dense<0.000000e+00> : vector<8x384xf32>
    %40 = tpu.matmul %37, %39, %cst_23 {dimension_numbers = #tpu.dot_dimension_numbers<[1], [0], [0], [1], [0, 0, 1, 1], [], []>} : vector<8x128xbf16>, vector<128x384xbf16>, vector<8x384xf32> -> vector<8x384xf32>
    %41 = arith.truncf %40 : vector<8x384xf32> to vector<8x384xbf16>
    %42 = vector.extract_strided_slice %40 {offsets = [0, 256], sizes = [8, 2], strides = [1, 1]} : vector<8x384xf32> to vector<8x2xf32>
    %43 = tpu.transpose %42, [1, 0] : vector<8x2xf32> -> vector<2x8xf32>
    %44 = vector.extract_strided_slice %40 {offsets = [0, 258], sizes = [8, 1], strides = [1, 1]} : vector<8x384xf32> to vector<8x1xf32>
    %45 = vector.extract_strided_slice %43 {offsets = [0, 0], sizes = [1, 8], strides = [1, 1]} : vector<2x8xf32> to vector<1x8xf32>
    %46 = vector.broadcast %44 : vector<8x1xf32> to vector<8x8xf32>
    %47 = vector.broadcast %45 : vector<1x8xf32> to vector<8x8xf32>
    %48 = arith.addf %46, %47 : vector<8x8xf32>
    %cst_24 = arith.constant 0.000000e+00 : f32
    %49 = vector.broadcast %cst_24 : f32 to vector<8x8xf32>
    %50 = arith.cmpf ogt, %48, %49 : vector<8x8xf32>
    %cst_25 = arith.constant 0.00999999977 : f32
    %51 = vector.broadcast %cst_25 : f32 to vector<8x8xf32>
    %52 = arith.mulf %51, %48 : vector<8x8xf32>
    %53 = arith.select %50, %48, %52 : vector<8x8xi1>, vector<8x8xf32>
    %54 = vector.broadcast %36 : vector<1x8xf32> to vector<8x8xf32>
    %55 = arith.mulf %53, %54 : vector<8x8xf32>
    %cst_26 = arith.constant -1.000000e+30 : f32
    %56 = vector.broadcast %cst_26 : f32 to vector<8x8xf32>
    %57 = arith.select %35, %55, %56 : vector<8x8xi1>, vector<8x8xf32>
    %cst_27 = arith.constant dense<0xFF800000> : vector<8xf32>
    %58 = vector.multi_reduction <maximumf>, %57, %cst_27 [1] : vector<8x8xf32> to vector<8xf32>
    %59 = vector.shape_cast %58 : vector<8xf32> to vector<8x1xf32>
    %60 = vector.broadcast %59 : vector<8x1xf32> to vector<8x8xf32>
    %61 = arith.subf %57, %60 : vector<8x8xf32>
    %62 = math.exp %61 : vector<8x8xf32>
    %cst_28 = arith.constant dense<0.000000e+00> : vector<8xf32>
    %63 = vector.multi_reduction <add>, %62, %cst_28 [1] : vector<8x8xf32> to vector<8xf32>
    %64 = vector.shape_cast %63 : vector<8xf32> to vector<8x1xf32>
    %65 = vector.broadcast %64 : vector<8x1xf32> to vector<8x8xf32>
    %66 = arith.divf %62, %65 : vector<8x8xf32>
    %67 = arith.truncf %66 : vector<8x8xf32> to vector<8x8xbf16>
    %68 = vector.extract_strided_slice %41 {offsets = [0, 0], sizes = [8, 128], strides = [1, 1]} : vector<8x384xbf16> to vector<8x128xbf16>
    %cst_29 = arith.constant dense<0.000000e+00> : vector<8x128xf32>
    %69 = tpu.matmul %67, %68, %cst_29 {dimension_numbers = #tpu.dot_dimension_numbers<[1], [0], [0], [1], [0, 0, 1, 1], [], []>} : vector<8x8xbf16>, vector<8x128xbf16>, vector<8x128xf32> -> vector<8x128xf32>
    %70 = vector.extract_strided_slice %40 {offsets = [0, 259], sizes = [8, 1], strides = [1, 1]} : vector<8x384xf32> to vector<8x1xf32>
    %71 = vector.extract_strided_slice %43 {offsets = [1, 0], sizes = [1, 8], strides = [1, 1]} : vector<2x8xf32> to vector<1x8xf32>
    %72 = vector.broadcast %70 : vector<8x1xf32> to vector<8x8xf32>
    %73 = vector.broadcast %71 : vector<1x8xf32> to vector<8x8xf32>
    %74 = arith.addf %72, %73 : vector<8x8xf32>
    %cst_30 = arith.constant 0.000000e+00 : f32
    %75 = vector.broadcast %cst_30 : f32 to vector<8x8xf32>
    %76 = arith.cmpf ogt, %74, %75 : vector<8x8xf32>
    %cst_31 = arith.constant 0.00999999977 : f32
    %77 = vector.broadcast %cst_31 : f32 to vector<8x8xf32>
    %78 = arith.mulf %77, %74 : vector<8x8xf32>
    %79 = arith.select %76, %74, %78 : vector<8x8xi1>, vector<8x8xf32>
    %80 = vector.broadcast %36 : vector<1x8xf32> to vector<8x8xf32>
    %81 = arith.mulf %79, %80 : vector<8x8xf32>
    %cst_32 = arith.constant -1.000000e+30 : f32
    %82 = vector.broadcast %cst_32 : f32 to vector<8x8xf32>
    %83 = arith.select %35, %81, %82 : vector<8x8xi1>, vector<8x8xf32>
    %cst_33 = arith.constant dense<0xFF800000> : vector<8xf32>
    %84 = vector.multi_reduction <maximumf>, %83, %cst_33 [1] : vector<8x8xf32> to vector<8xf32>
    %85 = vector.shape_cast %84 : vector<8xf32> to vector<8x1xf32>
    %86 = vector.broadcast %85 : vector<8x1xf32> to vector<8x8xf32>
    %87 = arith.subf %83, %86 : vector<8x8xf32>
    %88 = math.exp %87 : vector<8x8xf32>
    %cst_34 = arith.constant dense<0.000000e+00> : vector<8xf32>
    %89 = vector.multi_reduction <add>, %88, %cst_34 [1] : vector<8x8xf32> to vector<8xf32>
    %90 = vector.shape_cast %89 : vector<8xf32> to vector<8x1xf32>
    %91 = vector.broadcast %90 : vector<8x1xf32> to vector<8x8xf32>
    %92 = arith.divf %88, %91 : vector<8x8xf32>
    %93 = arith.truncf %92 : vector<8x8xf32> to vector<8x8xbf16>
    %94 = vector.extract_strided_slice %41 {offsets = [0, 128], sizes = [8, 128], strides = [1, 1]} : vector<8x384xbf16> to vector<8x128xbf16>
    %cst_35 = arith.constant dense<0.000000e+00> : vector<8x128xf32>
    %95 = tpu.matmul %93, %94, %cst_35 {dimension_numbers = #tpu.dot_dimension_numbers<[1], [0], [0], [1], [0, 0, 1, 1], [], []>} : vector<8x8xbf16>, vector<8x128xbf16>, vector<8x128xf32> -> vector<8x128xf32>
    %96 = tpu.concatenate %69, %95 in 1 : vector<8x128xf32>, vector<8x128xf32> -> vector<8x256xf32>
    %c0_36 = arith.constant 0 : index
    %c0_37 = arith.constant 0 : index
    %c0_38 = arith.constant 0 : index
    %97 = vector.load %arg9[%c0_36, %c0_37, %c0_38] : memref<2x1x256xf32, #tpu.memory_space<vmem>>, vector<1x1x256xf32>
    %98 = vector.shape_cast %97 : vector<1x1x256xf32> to vector<1x256xf32>
    %99 = vector.broadcast %98 : vector<1x256xf32> to vector<8x256xf32>
    %100 = arith.addf %96, %99 : vector<8x256xf32>
    %c0_39 = arith.constant 0 : index
    %c0_40 = arith.constant 0 : index
    %c0_41 = arith.constant 0 : index
    %101 = vector.load %arg10[%c0_39, %c0_40, %c0_41] : memref<2x1x256xf32, #tpu.memory_space<vmem>>, vector<1x1x256xf32>
    %102 = vector.shape_cast %101 : vector<1x1x256xf32> to vector<1x256xf32>
    %c0_42 = arith.constant 0 : index
    %c0_43 = arith.constant 0 : index
    %c0_44 = arith.constant 0 : index
    %103 = vector.load %arg11[%c0_42, %c0_43, %c0_44] : memref<2x1x256xf32, #tpu.memory_space<vmem>>, vector<1x1x256xf32>
    %104 = vector.shape_cast %103 : vector<1x1x256xf32> to vector<1x256xf32>
    %cst_45 = arith.constant dense<0.000000e+00> : vector<256xf32>
    %105 = vector.multi_reduction <add>, %100, %cst_45 [0] : vector<8x256xf32> to vector<256xf32>
    %106 = vector.shape_cast %105 : vector<256xf32> to vector<1x256xf32>
    %cst_46 = arith.constant 8.000000e+00 : f32
    %107 = vector.broadcast %cst_46 : f32 to vector<1x256xf32>
    %108 = arith.divf %106, %107 : vector<1x256xf32>
    %109 = vector.broadcast %108 : vector<1x256xf32> to vector<8x256xf32>
    %110 = arith.subf %100, %109 : vector<8x256xf32>
    %111 = arith.mulf %110, %110 : vector<8x256xf32>
    %cst_47 = arith.constant dense<0.000000e+00> : vector<256xf32>
    %112 = vector.multi_reduction <add>, %111, %cst_47 [0] : vector<8x256xf32> to vector<256xf32>
    %113 = vector.shape_cast %112 : vector<256xf32> to vector<1x256xf32>
    %cst_48 = arith.constant 8.000000e+00 : f32
    %114 = vector.broadcast %cst_48 : f32 to vector<1x256xf32>
    %115 = arith.divf %113, %114 : vector<1x256xf32>
    %116 = vector.broadcast %108 : vector<1x256xf32> to vector<8x256xf32>
    %117 = arith.subf %100, %116 : vector<8x256xf32>
    %118 = vector.broadcast %102 : vector<1x256xf32> to vector<8x256xf32>
    %119 = arith.mulf %118, %117 : vector<8x256xf32>
    %cst_49 = arith.constant 9.99999974E-6 : f32
    %120 = vector.broadcast %cst_49 : f32 to vector<1x256xf32>
    %121 = arith.addf %115, %120 : vector<1x256xf32>
    %122 = math.rsqrt %121 : vector<1x256xf32>
    %123 = vector.broadcast %122 : vector<1x256xf32> to vector<8x256xf32>
    %124 = arith.mulf %119, %123 : vector<8x256xf32>
    %125 = vector.broadcast %104 : vector<1x256xf32> to vector<8x256xf32>
    %126 = arith.addf %124, %125 : vector<8x256xf32>
    %127 = arith.truncf %126 : vector<8x256xf32> to vector<8x256xbf16>
    %c0_50 = arith.constant 0 : index
    %c0_51 = arith.constant 0 : index
    %c0_52 = arith.constant 0 : index
    %128 = vector.load %arg12[%c0_50, %c0_51, %c0_52] : memref<2x256x128xbf16, #tpu.memory_space<vmem>>, vector<1x256x128xbf16>
    %129 = vector.shape_cast %128 : vector<1x256x128xbf16> to vector<256x128xbf16>
    %cst_53 = arith.constant dense<0.000000e+00> : vector<8x128xf32>
    %130 = tpu.matmul %127, %129, %cst_53 {dimension_numbers = #tpu.dot_dimension_numbers<[1], [0], [0], [1], [0, 0, 1, 1], [], []>} : vector<8x256xbf16>, vector<256x128xbf16>, vector<8x128xf32> -> vector<8x128xf32>
    %131 = arith.addf %130, %32 : vector<8x128xf32>
    %132 = arith.truncf %131 : vector<8x128xf32> to vector<8x128xbf16>
    %c1 = arith.constant 1 : index
    %c0_54 = arith.constant 0 : index
    %c0_55 = arith.constant 0 : index
    %133 = vector.load %arg8[%c1, %c0_54, %c0_55] : memref<2x128x384xbf16, #tpu.memory_space<vmem>>, vector<1x128x384xbf16>
    %134 = vector.shape_cast %133 : vector<1x128x384xbf16> to vector<128x384xbf16>
    %cst_56 = arith.constant dense<0.000000e+00> : vector<8x384xf32>
    %135 = tpu.matmul %132, %134, %cst_56 {dimension_numbers = #tpu.dot_dimension_numbers<[1], [0], [0], [1], [0, 0, 1, 1], [], []>} : vector<8x128xbf16>, vector<128x384xbf16>, vector<8x384xf32> -> vector<8x384xf32>
    %136 = arith.truncf %135 : vector<8x384xf32> to vector<8x384xbf16>
    %137 = vector.extract_strided_slice %135 {offsets = [0, 256], sizes = [8, 2], strides = [1, 1]} : vector<8x384xf32> to vector<8x2xf32>
    %138 = tpu.transpose %137, [1, 0] : vector<8x2xf32> -> vector<2x8xf32>
    %139 = vector.extract_strided_slice %135 {offsets = [0, 258], sizes = [8, 1], strides = [1, 1]} : vector<8x384xf32> to vector<8x1xf32>
    %140 = vector.extract_strided_slice %138 {offsets = [0, 0], sizes = [1, 8], strides = [1, 1]} : vector<2x8xf32> to vector<1x8xf32>
    %141 = vector.broadcast %139 : vector<8x1xf32> to vector<8x8xf32>
    %142 = vector.broadcast %140 : vector<1x8xf32> to vector<8x8xf32>
    %143 = arith.addf %141, %142 : vector<8x8xf32>
    %cst_57 = arith.constant 0.000000e+00 : f32
    %144 = vector.broadcast %cst_57 : f32 to vector<8x8xf32>
    %145 = arith.cmpf ogt, %143, %144 : vector<8x8xf32>
    %cst_58 = arith.constant 0.00999999977 : f32
    %146 = vector.broadcast %cst_58 : f32 to vector<8x8xf32>
    %147 = arith.mulf %146, %143 : vector<8x8xf32>
    %148 = arith.select %145, %143, %147 : vector<8x8xi1>, vector<8x8xf32>
    %149 = vector.broadcast %36 : vector<1x8xf32> to vector<8x8xf32>
    %150 = arith.mulf %148, %149 : vector<8x8xf32>
    %cst_59 = arith.constant -1.000000e+30 : f32
    %151 = vector.broadcast %cst_59 : f32 to vector<8x8xf32>
    %152 = arith.select %35, %150, %151 : vector<8x8xi1>, vector<8x8xf32>
    %cst_60 = arith.constant dense<0xFF800000> : vector<8xf32>
    %153 = vector.multi_reduction <maximumf>, %152, %cst_60 [1] : vector<8x8xf32> to vector<8xf32>
    %154 = vector.shape_cast %153 : vector<8xf32> to vector<8x1xf32>
    %155 = vector.broadcast %154 : vector<8x1xf32> to vector<8x8xf32>
    %156 = arith.subf %152, %155 : vector<8x8xf32>
    %157 = math.exp %156 : vector<8x8xf32>
    %cst_61 = arith.constant dense<0.000000e+00> : vector<8xf32>
    %158 = vector.multi_reduction <add>, %157, %cst_61 [1] : vector<8x8xf32> to vector<8xf32>
    %159 = vector.shape_cast %158 : vector<8xf32> to vector<8x1xf32>
    %160 = vector.broadcast %159 : vector<8x1xf32> to vector<8x8xf32>
    %161 = arith.divf %157, %160 : vector<8x8xf32>
    %162 = arith.truncf %161 : vector<8x8xf32> to vector<8x8xbf16>
    %163 = vector.extract_strided_slice %136 {offsets = [0, 0], sizes = [8, 128], strides = [1, 1]} : vector<8x384xbf16> to vector<8x128xbf16>
    %cst_62 = arith.constant dense<0.000000e+00> : vector<8x128xf32>
    %164 = tpu.matmul %162, %163, %cst_62 {dimension_numbers = #tpu.dot_dimension_numbers<[1], [0], [0], [1], [0, 0, 1, 1], [], []>} : vector<8x8xbf16>, vector<8x128xbf16>, vector<8x128xf32> -> vector<8x128xf32>
    %165 = vector.extract_strided_slice %135 {offsets = [0, 259], sizes = [8, 1], strides = [1, 1]} : vector<8x384xf32> to vector<8x1xf32>
    %166 = vector.extract_strided_slice %138 {offsets = [1, 0], sizes = [1, 8], strides = [1, 1]} : vector<2x8xf32> to vector<1x8xf32>
    %167 = vector.broadcast %165 : vector<8x1xf32> to vector<8x8xf32>
    %168 = vector.broadcast %166 : vector<1x8xf32> to vector<8x8xf32>
    %169 = arith.addf %167, %168 : vector<8x8xf32>
    %cst_63 = arith.constant 0.000000e+00 : f32
    %170 = vector.broadcast %cst_63 : f32 to vector<8x8xf32>
    %171 = arith.cmpf ogt, %169, %170 : vector<8x8xf32>
    %cst_64 = arith.constant 0.00999999977 : f32
    %172 = vector.broadcast %cst_64 : f32 to vector<8x8xf32>
    %173 = arith.mulf %172, %169 : vector<8x8xf32>
    %174 = arith.select %171, %169, %173 : vector<8x8xi1>, vector<8x8xf32>
    %175 = vector.broadcast %36 : vector<1x8xf32> to vector<8x8xf32>
    %176 = arith.mulf %174, %175 : vector<8x8xf32>
    %cst_65 = arith.constant -1.000000e+30 : f32
    %177 = vector.broadcast %cst_65 : f32 to vector<8x8xf32>
    %178 = arith.select %35, %176, %177 : vector<8x8xi1>, vector<8x8xf32>
    %cst_66 = arith.constant dense<0xFF800000> : vector<8xf32>
    %179 = vector.multi_reduction <maximumf>, %178, %cst_66 [1] : vector<8x8xf32> to vector<8xf32>
    %180 = vector.shape_cast %179 : vector<8xf32> to vector<8x1xf32>
    %181 = vector.broadcast %180 : vector<8x1xf32> to vector<8x8xf32>
    %182 = arith.subf %178, %181 : vector<8x8xf32>
    %183 = math.exp %182 : vector<8x8xf32>
    %cst_67 = arith.constant dense<0.000000e+00> : vector<8xf32>
    %184 = vector.multi_reduction <add>, %183, %cst_67 [1] : vector<8x8xf32> to vector<8xf32>
    %185 = vector.shape_cast %184 : vector<8xf32> to vector<8x1xf32>
    %186 = vector.broadcast %185 : vector<8x1xf32> to vector<8x8xf32>
    %187 = arith.divf %183, %186 : vector<8x8xf32>
    %188 = arith.truncf %187 : vector<8x8xf32> to vector<8x8xbf16>
    %189 = vector.extract_strided_slice %136 {offsets = [0, 128], sizes = [8, 128], strides = [1, 1]} : vector<8x384xbf16> to vector<8x128xbf16>
    %cst_68 = arith.constant dense<0.000000e+00> : vector<8x128xf32>
    %190 = tpu.matmul %188, %189, %cst_68 {dimension_numbers = #tpu.dot_dimension_numbers<[1], [0], [0], [1], [0, 0, 1, 1], [], []>} : vector<8x8xbf16>, vector<8x128xbf16>, vector<8x128xf32> -> vector<8x128xf32>
    %191 = tpu.concatenate %164, %190 in 1 : vector<8x128xf32>, vector<8x128xf32> -> vector<8x256xf32>
    %c1_69 = arith.constant 1 : index
    %c0_70 = arith.constant 0 : index
    %c0_71 = arith.constant 0 : index
    %192 = vector.load %arg9[%c1_69, %c0_70, %c0_71] : memref<2x1x256xf32, #tpu.memory_space<vmem>>, vector<1x1x256xf32>
    %193 = vector.shape_cast %192 : vector<1x1x256xf32> to vector<1x256xf32>
    %194 = vector.broadcast %193 : vector<1x256xf32> to vector<8x256xf32>
    %195 = arith.addf %191, %194 : vector<8x256xf32>
    %c1_72 = arith.constant 1 : index
    %c0_73 = arith.constant 0 : index
    %c0_74 = arith.constant 0 : index
    %196 = vector.load %arg10[%c1_72, %c0_73, %c0_74] : memref<2x1x256xf32, #tpu.memory_space<vmem>>, vector<1x1x256xf32>
    %197 = vector.shape_cast %196 : vector<1x1x256xf32> to vector<1x256xf32>
    %c1_75 = arith.constant 1 : index
    %c0_76 = arith.constant 0 : index
    %c0_77 = arith.constant 0 : index
    %198 = vector.load %arg11[%c1_75, %c0_76, %c0_77] : memref<2x1x256xf32, #tpu.memory_space<vmem>>, vector<1x1x256xf32>
    %199 = vector.shape_cast %198 : vector<1x1x256xf32> to vector<1x256xf32>
    %cst_78 = arith.constant dense<0.000000e+00> : vector<256xf32>
    %200 = vector.multi_reduction <add>, %195, %cst_78 [0] : vector<8x256xf32> to vector<256xf32>
    %201 = vector.shape_cast %200 : vector<256xf32> to vector<1x256xf32>
    %cst_79 = arith.constant 8.000000e+00 : f32
    %202 = vector.broadcast %cst_79 : f32 to vector<1x256xf32>
    %203 = arith.divf %201, %202 : vector<1x256xf32>
    %204 = vector.broadcast %203 : vector<1x256xf32> to vector<8x256xf32>
    %205 = arith.subf %195, %204 : vector<8x256xf32>
    %206 = arith.mulf %205, %205 : vector<8x256xf32>
    %cst_80 = arith.constant dense<0.000000e+00> : vector<256xf32>
    %207 = vector.multi_reduction <add>, %206, %cst_80 [0] : vector<8x256xf32> to vector<256xf32>
    %208 = vector.shape_cast %207 : vector<256xf32> to vector<1x256xf32>
    %cst_81 = arith.constant 8.000000e+00 : f32
    %209 = vector.broadcast %cst_81 : f32 to vector<1x256xf32>
    %210 = arith.divf %208, %209 : vector<1x256xf32>
    %211 = vector.broadcast %203 : vector<1x256xf32> to vector<8x256xf32>
    %212 = arith.subf %195, %211 : vector<8x256xf32>
    %213 = vector.broadcast %197 : vector<1x256xf32> to vector<8x256xf32>
    %214 = arith.mulf %213, %212 : vector<8x256xf32>
    %cst_82 = arith.constant 9.99999974E-6 : f32
    %215 = vector.broadcast %cst_82 : f32 to vector<1x256xf32>
    %216 = arith.addf %210, %215 : vector<1x256xf32>
    %217 = math.rsqrt %216 : vector<1x256xf32>
    %218 = vector.broadcast %217 : vector<1x256xf32> to vector<8x256xf32>
    %219 = arith.mulf %214, %218 : vector<8x256xf32>
    %220 = vector.broadcast %199 : vector<1x256xf32> to vector<8x256xf32>
    %221 = arith.addf %219, %220 : vector<8x256xf32>
    %222 = arith.truncf %221 : vector<8x256xf32> to vector<8x256xbf16>
    %c1_83 = arith.constant 1 : index
    %c0_84 = arith.constant 0 : index
    %c0_85 = arith.constant 0 : index
    %223 = vector.load %arg12[%c1_83, %c0_84, %c0_85] : memref<2x256x128xbf16, #tpu.memory_space<vmem>>, vector<1x256x128xbf16>
    %224 = vector.shape_cast %223 : vector<1x256x128xbf16> to vector<256x128xbf16>
    %cst_86 = arith.constant dense<0.000000e+00> : vector<8x128xf32>
    %225 = tpu.matmul %222, %224, %cst_86 {dimension_numbers = #tpu.dot_dimension_numbers<[1], [0], [0], [1], [0, 0, 1, 1], [], []>} : vector<8x256xbf16>, vector<256x128xbf16>, vector<8x128xf32> -> vector<8x128xf32>
    %226 = arith.addf %225, %131 : vector<8x128xf32>
    %c0_87 = arith.constant 0 : index
    %c0_88 = arith.constant 0 : index
    %227 = vector.load %arg19[%c0_87, %c0_88] : memref<8x128xf32, #tpu.memory_space<vmem>>, vector<8x128xf32>
    tpu.vector_store %arg19[%c0_87, %c0_88], %226 {strides = array<i32>} : memref<8x128xf32, #tpu.memory_space<vmem>>, vector<8x128xf32>,
    %c0_89 = arith.constant 0 : index
    %c0_90 = arith.constant 0 : index
    %228 = vector.load %arg7[%c0_89, %c0_90] : memref<8x1xi32, #tpu.memory_space<vmem>>, vector<8x1xi32>
    %c0_i32 = arith.constant 0 : i32
    %229 = vector.broadcast %c0_i32 : i32 to vector<8x1xi32>
    %230 = arith.cmpi eq, %228, %229 : vector<8x1xi32>
    %cst_91 = arith.constant 0.000000e+00 : f32
    %231 = vector.shape_cast %230 : vector<8x1xi1> to vector<8x1xi1>
    %232 = vector.broadcast %231 : vector<8x1xi1> to vector<8x128xi1>
    %233 = vector.broadcast %cst_91 : f32 to vector<8x128xf32>
    %234 = arith.select %232, %226, %233 : vector<8x128xi1>, vector<8x128xf32>
    %cst_92 = arith.constant dense<0.000000e+00> : vector<128xf32>
    %235 = vector.multi_reduction <add>, %234, %cst_92 [0] : vector<8x128xf32> to vector<128xf32>
    %236 = vector.shape_cast %235 : vector<128xf32> to vector<1x128xf32>
    %c1_i32 = arith.constant 1 : i32
    %237 = vector.broadcast %c1_i32 : i32 to vector<8x1xi32>
    %238 = arith.cmpi eq, %228, %237 : vector<8x1xi32>
    %cst_93 = arith.constant 0.000000e+00 : f32
    %239 = vector.shape_cast %238 : vector<8x1xi1> to vector<8x1xi1>
    %240 = vector.broadcast %239 : vector<8x1xi1> to vector<8x128xi1>
    %241 = vector.broadcast %cst_93 : f32 to vector<8x128xf32>
    %242 = arith.select %240, %226, %241 : vector<8x128xi1>, vector<8x128xf32>
    %cst_94 = arith.constant dense<0.000000e+00> : vector<128xf32>
    %243 = vector.multi_reduction <add>, %242, %cst_94 [0] : vector<8x128xf32> to vector<128xf32>
    %244 = vector.shape_cast %243 : vector<128xf32> to vector<1x128xf32>
    %245 = tpu.concatenate %236, %244 in 0 : vector<1x128xf32>, vector<1x128xf32> -> vector<2x128xf32>
    %c0_95 = arith.constant 0 : index
    %c0_96 = arith.constant 0 : index
    %246 = vector.load %arg20[%c0_95, %c0_96] : memref<2x128xf32, #tpu.memory_space<vmem>>, vector<2x128xf32>
    tpu.vector_store %arg20[%c0_95, %c0_96], %245 {strides = array<i32>} : memref<2x128xf32, #tpu.memory_space<vmem>>, vector<2x128xf32>,
    %247 = arith.truncf %245 : vector<2x128xf32> to vector<2x128xbf16>
    %c0_97 = arith.constant 0 : index
    %c0_98 = arith.constant 0 : index
    %248 = vector.load %arg13[%c0_97, %c0_98] : memref<128x128xbf16, #tpu.memory_space<vmem>>, vector<128x128xbf16>
    %cst_99 = arith.constant dense<0.000000e+00> : vector<2x128xf32>
    %249 = tpu.matmul %247, %248, %cst_99 {dimension_numbers = #tpu.dot_dimension_numbers<[1], [0], [0], [1], [0, 0, 1, 1], [], []>} : vector<2x128xbf16>, vector<128x128xbf16>, vector<2x128xf32> -> vector<2x128xf32>
    %c0_100 = arith.constant 0 : index
    %c0_101 = arith.constant 0 : index
    %250 = vector.load %arg14[%c0_100, %c0_101] : memref<1x128xf32, #tpu.memory_space<vmem>>, vector<1x128xf32>
    %251 = vector.broadcast %250 : vector<1x128xf32> to vector<2x128xf32>
    %252 = arith.addf %249, %251 : vector<2x128xf32>
    %c0_102 = arith.constant 0 : index
    %c0_103 = arith.constant 0 : index
    %253 = vector.load %arg15[%c0_102, %c0_103] : memref<128x128xbf16, #tpu.memory_space<vmem>>, vector<128x128xbf16>
    %cst_104 = arith.constant dense<0.000000e+00> : vector<2x128xf32>
    %254 = tpu.matmul %247, %253, %cst_104 {dimension_numbers = #tpu.dot_dimension_numbers<[1], [0], [0], [1], [0, 0, 1, 1], [], []>} : vector<2x128xbf16>, vector<128x128xbf16>, vector<2x128xf32> -> vector<2x128xf32>
    %c0_105 = arith.constant 0 : index
    %c0_106 = arith.constant 0 : index
    %255 = vector.load %arg16[%c0_105, %c0_106] : memref<1x128xf32, #tpu.memory_space<vmem>>, vector<1x128xf32>
    %256 = vector.broadcast %255 : vector<1x128xf32> to vector<2x128xf32>
    %257 = arith.addf %254, %256 : vector<2x128xf32>
    %c0_107 = arith.constant 0 : index
    %c0_108 = arith.constant 0 : index
    %258 = vector.load %arg21[%c0_107, %c0_108] : memref<2x128xf32, #tpu.memory_space<vmem>>, vector<2x128xf32>
    tpu.vector_store %arg21[%c0_107, %c0_108], %252 {strides = array<i32>} : memref<2x128xf32, #tpu.memory_space<vmem>>, vector<2x128xf32>,
    %c0_109 = arith.constant 0 : index
    %c0_110 = arith.constant 0 : index
    %259 = vector.load %arg22[%c0_109, %c0_110] : memref<2x128xf32, #tpu.memory_space<vmem>>, vector<2x128xf32>
    tpu.vector_store %arg22[%c0_109, %c0_110], %257 {strides = array<i32>} : memref<2x128xf32, #tpu.memory_space<vmem>>, vector<2x128xf32>,
    %c0_111 = arith.constant 0 : index
    %c0_112 = arith.constant 0 : index
    %260 = vector.load %arg17[%c0_111, %c0_112] : memref<2x128xf32, #tpu.memory_space<vmem>>, vector<2x128xf32>
    %cst_113 = arith.constant 5.000000e-01 : f32
    %261 = vector.broadcast %cst_113 : f32 to vector<2x128xf32>
    %262 = arith.mulf %261, %257 : vector<2x128xf32>
    %263 = math.exp %262 : vector<2x128xf32>
    %264 = arith.mulf %260, %263 : vector<2x128xf32>
    %265 = arith.addf %264, %252 : vector<2x128xf32>
    %c0_114 = arith.constant 0 : index
    %c0_115 = arith.constant 0 : index
    %266 = vector.load %arg23[%c0_114, %c0_115] : memref<2x128xf32, #tpu.memory_space<vmem>>, vector<2x128xf32>
    tpu.vector_store %arg23[%c0_114, %c0_115], %265 {strides = array<i32>} : memref<2x128xf32, #tpu.memory_space<vmem>>, vector<2x128xf32>,
    %267 = arith.truncf %226 : vector<8x128xf32> to vector<8x128xbf16>
    %c0_116 = arith.constant 0 : index
    %c0_117 = arith.constant 0 : index
    %268 = vector.load %arg13[%c0_116, %c0_117] : memref<128x128xbf16, #tpu.memory_space<vmem>>, vector<128x128xbf16>
    %cst_118 = arith.constant dense<0.000000e+00> : vector<8x128xf32>
    %269 = tpu.matmul %267, %268, %cst_118 {dimension_numbers = #tpu.dot_dimension_numbers<[1], [0], [0], [1], [0, 0, 1, 1], [], []>} : vector<8x128xbf16>, vector<128x128xbf16>, vector<8x128xf32> -> vector<8x128xf32>
    %c0_119 = arith.constant 0 : index
    %c0_120 = arith.constant 0 : index
    %270 = vector.load %arg14[%c0_119, %c0_120] : memref<1x128xf32, #tpu.memory_space<vmem>>, vector<1x128xf32>
    %271 = vector.broadcast %270 : vector<1x128xf32> to vector<8x128xf32>
    %272 = arith.addf %269, %271 : vector<8x128xf32>
    %c0_121 = arith.constant 0 : index
    %c0_122 = arith.constant 0 : index
    %273 = vector.load %arg15[%c0_121, %c0_122] : memref<128x128xbf16, #tpu.memory_space<vmem>>, vector<128x128xbf16>
    %cst_123 = arith.constant dense<0.000000e+00> : vector<8x128xf32>
    %274 = tpu.matmul %267, %273, %cst_123 {dimension_numbers = #tpu.dot_dimension_numbers<[1], [0], [0], [1], [0, 0, 1, 1], [], []>} : vector<8x128xbf16>, vector<128x128xbf16>, vector<8x128xf32> -> vector<8x128xf32>
    %c0_124 = arith.constant 0 : index
    %c0_125 = arith.constant 0 : index
    %275 = vector.load %arg16[%c0_124, %c0_125] : memref<1x128xf32, #tpu.memory_space<vmem>>, vector<1x128xf32>
    %276 = vector.broadcast %275 : vector<1x128xf32> to vector<8x128xf32>
    %277 = arith.addf %274, %276 : vector<8x128xf32>
    %c0_126 = arith.constant 0 : index
    %c0_127 = arith.constant 0 : index
    %278 = vector.load %arg18[%c0_126, %c0_127] : memref<8x128xf32, #tpu.memory_space<vmem>>, vector<8x128xf32>
    %cst_128 = arith.constant 5.000000e-01 : f32
    %279 = vector.broadcast %cst_128 : f32 to vector<8x128xf32>
    %280 = arith.mulf %279, %277 : vector<8x128xf32>
    %281 = math.exp %280 : vector<8x128xf32>
    %282 = arith.mulf %278, %281 : vector<8x128xf32>
    %283 = arith.addf %282, %272 : vector<8x128xf32>
    %c0_129 = arith.constant 0 : index
    %c0_130 = arith.constant 0 : index
    %284 = vector.load %arg24[%c0_129, %c0_130] : memref<8x128xf32, #tpu.memory_space<vmem>>, vector<8x128xf32>
    tpu.vector_store %arg24[%c0_129, %c0_130], %283 {strides = array<i32>} : memref<8x128xf32, #tpu.memory_space<vmem>>, vector<8x128xf32>,
    %cst_131 = arith.constant 1.000000e+00 : f32
    %285 = vector.broadcast %cst_131 : f32 to vector<2x128xf32>
    %286 = arith.addf %285, %257 : vector<2x128xf32>
    %287 = arith.mulf %252, %252 : vector<2x128xf32>
    %288 = arith.subf %286, %287 : vector<2x128xf32>
    %289 = math.exp %257 : vector<2x128xf32>
    %290 = arith.subf %288, %289 : vector<2x128xf32>
    %cst_132 = arith.constant dense<0.000000e+00> : vector<2xf32>
    %291 = vector.multi_reduction <add>, %290, %cst_132 [1] : vector<2x128xf32> to vector<2xf32>
    %292 = vector.shape_cast %291 : vector<2xf32> to vector<2x1xf32>
    %cst_133 = arith.constant dense<0.000000e+00> : vector<1xf32>
    %293 = vector.multi_reduction <add>, %292, %cst_133 [0] : vector<2x1xf32> to vector<1xf32>
    %294 = vector.shape_cast %293 : vector<1xf32> to vector<1x1xf32>
    %cst_134 = arith.constant 2.000000e+00 : f32
    %295 = vector.broadcast %cst_134 : f32 to vector<1x1xf32>
    %296 = arith.divf %294, %295 : vector<1x1xf32>
    %cst_135 = arith.constant -5.000000e-04 : f32
    %297 = vector.broadcast %cst_135 : f32 to vector<1x1xf32>
    %298 = arith.mulf %297, %296 : vector<1x1xf32>
    %299 = vector.shape_cast %298 : vector<1x1xf32> to vector<1x1xf32>
    %300 = vector.broadcast %299 : vector<1x1xf32> to vector<1x128xf32>
    %c0_136 = arith.constant 0 : index
    %c0_137 = arith.constant 0 : index
    %301 = vector.load %arg25[%c0_136, %c0_137] : memref<1x128xf32, #tpu.memory_space<vmem>>, vector<1x128xf32>
    tpu.vector_store %arg25[%c0_136, %c0_137], %300 {strides = array<i32>} : memref<1x128xf32, #tpu.memory_space<vmem>>, vector<1x128xf32>,
    return
  }
}

</mosaic_0001>

<bundles_post_ra>
// kernel: tpu_custom_call.1
= control target key start
LH: loop header
LB: loop body
LE: loop exit
PB: predicated region body
PF: predicated region fallthrough
CT: control target
= control target key end

     0   :  { %s4203_s0 = inlined_call_operand.hbm [shape: f32[8,128], index: 0, kind: input, shape index: {}]   ;;  %s4204_s1 = inlined_call_operand.hbm [shape: bf16[128,128], index: 1, kind: input, shape index: {}]   ;;  %s4205_s2 = inlined_call_operand.vmem [shape: f32[1,128], index: 2, kind: input, shape index: {}]   ;;  %s4206_s3 = inlined_call_operand.hbm [shape: f32[1,128], index: 3, kind: input, shape index: {}]   ;;  %s4207_s4 = inlined_call_operand.hbm [shape: f32[1,128], index: 4, kind: input, shape index: {}]   ;;  %s4208_s5 = inlined_call_operand.hbm [shape: bf16[8,8], index: 5, kind: input, shape index: {}]   ;;  %s4209_s6 = inlined_call_operand.hbm [shape: f32[1,8], index: 6, kind: input, shape index: {}]   ;;  %s4210_s7 = inlined_call_operand.vmem [shape: s32[8,1], index: 7, kind: input, shape index: {}]   ;;  %s4211_s8 = inlined_call_operand.hbm [shape: bf16[2,128,384], index: 8, kind: input, shape index: {}]   ;;  %s4212_s9 = inlined_call_operand.hbm [shape: f32[2,1,256], index: 9, kind: input, shape index: {}]   ;;  %s4213_s10 = inlined_call_operand.hbm [shape: f32[2,1,256], index: 10, kind: input, shape index: {}]   ;;  %s4214_s11 = inlined_call_operand.hbm [shape: f32[2,1,256], index: 11, kind: input, shape index: {}]   ;;  %s4215_s12 = inlined_call_operand.hbm [shape: bf16[2,256,128], index: 12, kind: input, shape index: {}]   ;;  %s4216_s13 = inlined_call_operand.hbm [shape: bf16[128,128], index: 13, kind: input, shape index: {}]   ;;  %s4217_s14 = inlined_call_operand.hbm [shape: f32[1,128], index: 14, kind: input, shape index: {}]   ;;  %s4218_s15 = inlined_call_operand.vmem [shape: bf16[128,128], index: 15, kind: input, shape index: {}]   ;;  %s4219_s16 = inlined_call_operand.hbm [shape: f32[1,128], index: 16, kind: input, shape index: {}]   ;;  %s4220_s17 = inlined_call_operand.hbm [shape: f32[2,128], index: 17, kind: input, shape index: {}]   ;;  %s4221_s18 = inlined_call_operand.vmem [shape: f32[8,128], index: 18, kind: input, shape index: {}]   ;;  %s4222_s19 = inlined_call_operand.hbm [shape: f32[8,128], index: 19, kind: output, shape index: {0}]   ;;  %s4223_s20 = inlined_call_operand.hbm [shape: f32[2,128], index: 20, kind: output, shape index: {1}]   ;;  %s4224_s21 = inlined_call_operand.hbm [shape: f32[2,128], index: 21, kind: output, shape index: {2}]   ;;  %s4225_s22 = inlined_call_operand.hbm [shape: f32[2,128], index: 22, kind: output, shape index: {3}]   ;;  %s4226_s23 = inlined_call_operand.hbm [shape: f32[2,128], index: 23, kind: output, shape index: {4}]   ;;  %s4227_s24 = inlined_call_operand.hbm [shape: f32[8,128], index: 24, kind: output, shape index: {5}]   ;;  %s4228_s25 = inlined_call_operand.hbm [shape: f32[1,128], index: 25, kind: output, shape index: {6}]  }
   0x1   :  { %4242 = sst [smem:[#allocation48_spill]] %s4203_s0 }
   0x2   :  { %4243 = sst [smem:[#allocation49_spill]] %s4204_s1 }
   0x3   :  { %4244 = sst [smem:[#allocation50_spill]] %s4205_s2 }
   0x4   :  { %4245 = sst [smem:[#allocation51_spill]] %s4206_s3 }
   0x5   :  { %4246 = sst [smem:[#allocation52_spill]] %s4207_s4 }
   0x6   :  { %4247 = sst [smem:[#allocation53_spill]] %s4208_s5 }
   0x7   :  { %4248 = sst [smem:[#allocation54_spill]] %s4209_s6 }
   0x8   :  { %4249 = sst [smem:[#allocation55_spill]] %s4210_s7 }
   0x9   :  { %4250 = sst [smem:[#allocation56_spill]] %s4211_s8 }
   0xa   :  { %4251 = sst [smem:[#allocation57_spill]] %s4212_s9 }
   0xb   :  { %4252 = sst [smem:[#allocation58_spill]] %s4224_s21 }
   0xc   :  { %4253 = sst [smem:[#allocation59_spill]] %s4226_s23 }
   0xd   :  { %4254 = sst [smem:[#allocation60_spill]] %s4228_s25 }
   0xe   :  { %31 = vsyncpa [#allocation3], 0 }
   0xf   :  { %32 = vsyncpa [#allocation6], 0 }
  0x10   :  { %33 = vsyncpa [#allocation9], 0 }
  0x11   :  { %34 = vsyncpa [#allocation12], 0 }
  0x12   :  { %35 = vsyncpa [#allocation15], 0 }
  0x13   :  { %36 = vsyncpa [#allocation18], 0 }
  0x14   :  { %37 = vsyncpa [#allocation21], 0 }
  0x15   :  { %38 = vsyncpa [#allocation24], 0 }
  0x16   :  { %39 = vsyncpa [#allocation4], 0 }
  0x17   :  { %40 = vsyncpa [#allocation28], 0 }
  0x18   :  { %41 = vsyncpa [#allocation31], 0 }
  0x19   :  { %42 = vsyncpa [#allocation34], 0  ;;  %s3517_s29 = smov [#allocation5]   ;;  %s4255_s7 = sld [smem:[#allocation49_spill]] }
  0x1a   :  { %s58_s2 = sshll.u32 %s3517_s29, 4  ;;  %s59_s2 = int_to_ptr.vmem [resolvable:$true] %s58_s2 }
  0x1f   :  { %s3009_s3 = scalar_lea.hbm %s4255_s7, 1024 }
  0x20   :  { %p3010_p0 = scmp.ne.s32.totalorder %s4255_s7, %s3009_s3  ;;  %p3013_p1 = scmp.lt.u32.totalorder %s3009_s3, %s4255_s7 }
  0x22   :  { %p3015_p2 = pnand %p3013_p1, %p3010_p0 }
  0x24   :  { %3018 = shalt.err (!%p3015_p2)
}
  0x25   :  { %s3019_s4 = scalar_lea.vmem %s59_s2, 1024  ;;  %p3024_p4 = scmp.lt.s32.totalorder %s59_s2, %s59_s2 }
  0x26   :  { %p3020_p3 = scmp.ne.s32.totalorder %s59_s2, %s3019_s4  ;;  %p3025_p5 = scmp.lt.s32.totalorder %s3019_s4, %s3019_s4 }
  0x28   :  { %p3026_p6 = por %p3025_p5, %p3024_p4 }
  0x2a   :  { %p3027_p7 = pnand %p3026_p6, %p3020_p3 }
  0x2c   :  { %3030 = shalt.err (!%p3027_p7)
}
  0x2d   :  { %s4240_s28 = smov 64   ;;  %s3519_s9 = smov 4  }
  0x2e   :  { %64 = dma.hbm_to_vmem [thread:$0]  %s4255_s7, 1024, %s59_s2, [#allocation6], %s4240_s28, %s4240_s28, %s3519_s9  }
  0x2f   :  { %s3520_s29 = smov [#allocation8]   ;;  %s3521_s30 = smov [#allocation11]  }
  0x30   :  { %s83_s6 = sshll.u32 %s3520_s29, 4  ;;  %s103_s3 = sshll.u32 %s3521_s30, 4  ;;  %s84_s6 = int_to_ptr.vmem [resolvable:$true] %s83_s6  ;;  %s104_s3 = int_to_ptr.vmem [resolvable:$true] %s103_s3 }
  0x31   :  { %s4256_s8 = sld [smem:[#allocation52_spill]] }
  0x37   :  { %s3031_s27 = scalar_lea.hbm %s4256_s8, 16 }
  0x38   :  { %p3032_p8 = scmp.ne.s32.totalorder %s4256_s8, %s3031_s27  ;;  %p3035_p9 = scmp.lt.u32.totalorder %s3031_s27, %s4256_s8 }
  0x3a   :  { %p3037_p10 = pnand %p3035_p9, %p3032_p8 }
  0x3c   :  { %3040 = shalt.err (!%p3037_p10)
}
  0x3d   :  { %s3041_s2 = scalar_lea.vmem %s84_s6, 16  ;;  %s3045_s7 = scalar_lea.vmem %s84_s6, 32 }
  0x3e   :  { %p3042_p11 = scmp.ne.s32.totalorder %s84_s6, %s3041_s2  ;;  %p3046_p12 = scmp.lt.s32.totalorder %s84_s6, %s84_s6 }
  0x3f   :  { %p3047_p13 = scmp.lt.s32.totalorder %s3045_s7, %s3041_s2 }
  0x41   :  { %p3048_p0 = por %p3047_p13, %p3046_p12 }
  0x43   :  { %p3049_p1 = pnand %p3048_p0, %p3042_p11 }
  0x45   :  { %3052 = shalt.err (!%p3049_p1)
}
  0x46   :  { %86 = dma.hbm_to_vmem [thread:$0]  %s4256_s8, 16, %s84_s6, [#allocation9]  }
  0x47   :  { %s4257_s30 = sld [smem:[#allocation54_spill]] }
  0x4d   :  { %s3053_s21 = scalar_lea.hbm %s4257_s30, 16 }
  0x4e   :  { %p3054_p2 = scmp.ne.s32.totalorder %s4257_s30, %s3053_s21  ;;  %p3057_p3 = scmp.lt.u32.totalorder %s3053_s21, %s4257_s30 }
  0x50   :  { %p3059_p4 = pnand %p3057_p3, %p3054_p2 }
  0x52   :  { %3062 = shalt.err (!%p3059_p4)
}
  0x53   :  { %s3063_s4 = scalar_lea.vmem %s104_s3, 16  ;;  %s3067_s2 = scalar_lea.vmem %s104_s3, 32 }
  0x54   :  { %p3064_p5 = scmp.ne.s32.totalorder %s104_s3, %s3063_s4  ;;  %p3068_p6 = scmp.lt.s32.totalorder %s104_s3, %s104_s3 }
  0x55   :  { %p3069_p7 = scmp.lt.s32.totalorder %s3067_s2, %s3063_s4 }
  0x57   :  { %p3070_p8 = por %p3069_p7, %p3068_p6 }
  0x59   :  { %p3071_p9 = pnand %p3070_p8, %p3064_p5 }
  0x5b   :  { %3074 = shalt.err (!%p3071_p9)
}
  0x5c   :  { %106 = dma.hbm_to_vmem [thread:$0]  %s4257_s30, 16, %s104_s3, [#allocation12]  }
  0x5d   :  { %s3522_s7 = smov [#allocation14]   ;;  %s4258_s29 = sld [smem:[#allocation57_spill]] }
  0x5e   :  { %s126_s5 = sshll.u32 %s3522_s7, 4  ;;  %s127_s5 = int_to_ptr.vmem [resolvable:$true] %s126_s5 }
  0x63   :  { %s3075_s21 = scalar_lea.hbm %s4258_s29, 64 }
  0x64   :  { %p3076_p10 = scmp.ne.s32.totalorder %s4258_s29, %s3075_s21  ;;  %p3079_p11 = scmp.lt.u32.totalorder %s3075_s21, %s4258_s29 }
  0x66   :  { %p3081_p12 = pnand %p3079_p11, %p3076_p10 }
  0x68   :  { %3084 = shalt.err (!%p3081_p12)
}
  0x69   :  { %s3085_s4 = scalar_lea.vmem %s127_s5, 64  ;;  %p3090_p0 = scmp.lt.s32.totalorder %s127_s5, %s127_s5 }
  0x6a   :  { %p3086_p13 = scmp.ne.s32.totalorder %s127_s5, %s3085_s4  ;;  %p3091_p1 = scmp.lt.s32.totalorder %s3085_s4, %s3085_s4 }
  0x6c   :  { %p3092_p2 = por %p3091_p1, %p3090_p0 }
  0x6e   :  { %p3093_p3 = pnand %p3092_p2, %p3086_p13 }
  0x70   :  { %3096 = shalt.err (!%p3093_p3)
}
  0x71   :  { %s3523_s3 = smov 32   ;;  %s3524_s30 = smov 2  }
  0x72   :  { %132 = dma.hbm_to_vmem [thread:$0]  %s4258_s29, 64, %s127_s5, [#allocation15], %s3523_s3, %s3523_s3, %s3524_s30  }
  0x73   :  { %s3525_s8 = smov [#allocation17]   ;;  %s3526_s0 = smov [#allocation20]  }
  0x74   :  { %s150_s7 = sshll.u32 %s3525_s8, 4  ;;  %s174_s25 = sshll.u32 %s3526_s0, 4  ;;  %s151_s7 = int_to_ptr.vmem [resolvable:$true] %s150_s7  ;;  %s3734_s25 = int_to_ptr.vmem [resolvable:$true] %s174_s25 }
  0x75   :  { %s3097_s26 = scalar_lea.hbm %s4214_s11, 64 }
  0x76   :  { %p3098_p4 = scmp.ne.s32.totalorder %s4214_s11, %s3097_s26  ;;  %p3101_p5 = scmp.lt.u32.totalorder %s3097_s26, %s4214_s11 }
  0x78   :  { %p3103_p6 = pnand %p3101_p5, %p3098_p4 }
  0x7a   :  { %3106 = shalt.err (!%p3103_p6)
}
  0x7b   :  { %s3107_s5 = scalar_lea.vmem %s151_s7, 64  ;;  %p3112_p8 = scmp.lt.s32.totalorder %s151_s7, %s151_s7 }
  0x7c   :  { %p3108_p7 = scmp.ne.s32.totalorder %s151_s7, %s3107_s5  ;;  %p3113_p9 = scmp.lt.s32.totalorder %s3107_s5, %s3107_s5 }
  0x7e   :  { %p3114_p10 = por %p3113_p9, %p3112_p8 }
  0x80   :  { %p3115_p11 = pnand %p3114_p10, %p3108_p7 }
  0x82   :  { %3118 = shalt.err (!%p3115_p11)
}
  0x83   :  { %156 = dma.hbm_to_vmem [thread:$0]  %s4214_s11, 64, %s151_s7, [#allocation18], %s3523_s3, %s3523_s3, %s3524_s30  }
  0x84   :  { %s3119_s28 = scalar_lea.hbm %s4216_s13, 1024 }
  0x85   :  { %p3120_p12 = scmp.ne.s32.totalorder %s4216_s13, %s3119_s28  ;;  %p3123_p13 = scmp.lt.u32.totalorder %s3119_s28, %s4216_s13 }
  0x87   :  { %p3125_p0 = pnand %p3123_p13, %p3120_p12 }
  0x89   :  { %3128 = shalt.err (!%p3125_p0)
}
  0x8a   :  { %s3129_s1 = scalar_lea.vmem %s3734_s25, 1024  ;;  %p3134_p2 = scmp.lt.s32.totalorder %s3734_s25, %s3734_s25 }
  0x8b   :  { %p3130_p1 = scmp.ne.s32.totalorder %s3734_s25, %s3129_s1  ;;  %p3135_p3 = scmp.lt.s32.totalorder %s3129_s1, %s3129_s1 }
  0x8d   :  { %p3136_p4 = por %p3135_p3, %p3134_p2 }
  0x8f   :  { %p3137_p5 = pnand %p3136_p4, %p3130_p1 }
  0x91   :  { %3140 = shalt.err (!%p3137_p5)
}
  0x92   :  { %s4259_s11 = smov 64   ;;  %s3527_s4 = smov [#allocation23]  }
  0x93   :  { %180 = dma.hbm_to_vmem [thread:$0]  %s4216_s13, 1024, %s3734_s25, [#allocation21], %s4259_s11, %s4259_s11, %s3519_s9  }
  0x94   :  { %s199_s5 = sshll.u32 %s3527_s4, 4  ;;  %s3528_s29 = smov [#allocation2]   ;;  %s200_s5 = int_to_ptr.vmem [resolvable:$true] %s199_s5 }
  0x95   :  { %s49_s2 = sshll.u32 %s3528_s29, 4  ;;  %s3141_s28 = scalar_lea.hbm %s4219_s16, 16  ;;  %s50_s2 = int_to_ptr.vmem [resolvable:$true] %s49_s2 }
  0x96   :  { %p3142_p6 = scmp.ne.s32.totalorder %s4219_s16, %s3141_s28  ;;  %p3145_p7 = scmp.lt.u32.totalorder %s3141_s28, %s4219_s16 }
  0x98   :  { %p3147_p8 = pnand %p3145_p7, %p3142_p6 }
  0x9a   :  { %3150 = shalt.err (!%p3147_p8)
}
  0x9b   :  { %s3151_s13 = scalar_lea.vmem %s200_s5, 16  ;;  %s3155_s25 = scalar_lea.vmem %s200_s5, 32 }
  0x9c   :  { %p3152_p9 = scmp.ne.s32.totalorder %s200_s5, %s3151_s13  ;;  %p3156_p10 = scmp.lt.s32.totalorder %s200_s5, %s200_s5 }
  0x9d   :  { %p3157_p11 = scmp.lt.s32.totalorder %s3155_s25, %s3151_s13 }
  0x9f   :  { %p3158_p12 = por %p3157_p11, %p3156_p10 }
  0xa1   :  { %p3159_p13 = pnand %p3158_p12, %p3152_p9 }
  0xa3   :  { %3162 = shalt.err (!%p3159_p13)
}
  0xa4   :  { %202 = dma.hbm_to_vmem [thread:$0]  %s4219_s16, 16, %s200_s5, [#allocation24]  }
  0xa5   :  { %s4260_s29 = sld [smem:[#allocation48_spill]] }
  0xab   :  { %s3163_s6 = scalar_lea.hbm %s4260_s29, 128 }
  0xac   :  { %p3164_p0 = scmp.ne.s32.totalorder %s4260_s29, %s3163_s6  ;;  %p3167_p1 = scmp.lt.u32.totalorder %s3163_s6, %s4260_s29 }
  0xae   :  { %p3169_p2 = pnand %p3167_p1, %p3164_p0 }
  0xb0   :  { %3172 = shalt.err (!%p3169_p2)
}
  0xb1   :  { %s3173_s23 = scalar_lea.vmem %s50_s2, 128  ;;  %p3178_p4 = scmp.lt.s32.totalorder %s50_s2, %s50_s2 }
  0xb2   :  { %p3174_p3 = scmp.ne.s32.totalorder %s50_s2, %s3173_s23  ;;  %p3179_p5 = scmp.lt.s32.totalorder %s3173_s23, %s3173_s23 }
  0xb4   :  { %p3180_p6 = por %p3179_p5, %p3178_p4 }
  0xb6   :  { %p3181_p7 = pnand %p3180_p6, %p3174_p3 }
  0xb8   :  { %3184 = shalt.err (!%p3181_p7)
}
  0xb9   :  { %52 = dma.hbm_to_vmem [thread:$0]  %s4260_s29, 128, %s50_s2, [#allocation3]  }
  0xba   :  { %s3529_s26 = smov [#allocation7]   ;;  %s3530_s25 = smov [#allocation10]  }
  0xbb   :  { %s73_s13 = sshll.u32 %s3529_s26, 4  ;;  %s93_s1 = sshll.u32 %s3530_s25, 4  ;;  %s74_s13 = int_to_ptr.vmem [resolvable:$true] %s73_s13  ;;  %s94_s1 = int_to_ptr.vmem [resolvable:$true] %s93_s1 }
  0xbc   :  { %s4261_s4 = sld [smem:[#allocation51_spill]] }
  0xc2   :  { %s3185_s6 = scalar_lea.hbm %s4261_s4, 16 }
  0xc3   :  { %p3186_p8 = scmp.ne.s32.totalorder %s4261_s4, %s3185_s6  ;;  %p3189_p9 = scmp.lt.u32.totalorder %s3185_s6, %s4261_s4 }
  0xc5   :  { %p3191_p10 = pnand %p3189_p9, %p3186_p8 }
  0xc7   :  { %3194 = shalt.err (!%p3191_p10)
}
  0xc8   :  { %s3195_s2 = scalar_lea.vmem %s74_s13, 16  ;;  %s3199_s29 = scalar_lea.vmem %s74_s13, 32 }
  0xc9   :  { %p3196_p11 = scmp.ne.s32.totalorder %s74_s13, %s3195_s2  ;;  %p3200_p12 = scmp.lt.s32.totalorder %s74_s13, %s74_s13 }
  0xca   :  { %p3201_p13 = scmp.lt.s32.totalorder %s3199_s29, %s3195_s2 }
  0xcc   :  { %p3202_p0 = por %p3201_p13, %p3200_p12 }
  0xce   :  { %p3203_p1 = pnand %p3202_p0, %p3196_p11 }
  0xd0   :  { %3206 = shalt.err (!%p3203_p1)
}
  0xd1   :  { %76 = dma.hbm_to_vmem [thread:$0]  %s4261_s4, 16, %s74_s13, [#allocation6]  }
  0xd2   :  { %s4262_s25 = sld [smem:[#allocation53_spill]] }
  0xd8   :  { %s3207_s7 = scalar_lea.hbm %s4262_s25, 64 }
  0xd9   :  { %p3208_p2 = scmp.ne.s32.totalorder %s4262_s25, %s3207_s7  ;;  %p3211_p3 = scmp.lt.u32.totalorder %s3207_s7, %s4262_s25 }
  0xdb   :  { %p3213_p4 = pnand %p3211_p3, %p3208_p2 }
  0xdd   :  { %3216 = shalt.err (!%p3213_p4)
}
  0xde   :  { %s3217_s0 = scalar_lea.vmem %s94_s1, 64  ;;  %p3222_p6 = scmp.lt.s32.totalorder %s94_s1, %s94_s1 }
  0xdf   :  { %p3218_p5 = scmp.ne.s32.totalorder %s94_s1, %s3217_s0  ;;  %p3223_p7 = scmp.lt.s32.totalorder %s3217_s0, %s3217_s0 }
  0xe1   :  { %p3224_p8 = por %p3223_p7, %p3222_p6 }
  0xe3   :  { %p3225_p9 = pnand %p3224_p8, %p3218_p5 }
  0xe5   :  { %3228 = shalt.err (!%p3225_p9)
}
  0xe6   :  { %96 = dma.hbm_to_vmem [thread:$0]  %s4262_s25, 64, %s94_s1, [#allocation9]  }
  0xe7   :  { %s3531_s21 = smov [#allocation13]   ;;  %s4263_s16 = sld [smem:[#allocation56_spill]] }
  0xe8   :  { %s114_s2 = sshll.u32 %s3531_s21, 4  ;;  %s115_s2 = int_to_ptr.vmem [resolvable:$true] %s114_s2 }
  0xed   :  { %s3229_s5 = scalar_lea.hbm %s4263_s16, 6144 }
  0xee   :  { %p3230_p10 = scmp.ne.s32.totalorder %s4263_s16, %s3229_s5  ;;  %p3233_p11 = scmp.lt.u32.totalorder %s3229_s5, %s4263_s16 }
  0xf0   :  { %p3235_p12 = pnand %p3233_p11, %p3230_p10 }
  0xf2   :  { %3238 = shalt.err (!%p3235_p12)
}
  0xf3   :  { %s3239_s8 = scalar_lea.vmem %s115_s2, 6144  ;;  %p3244_p0 = scmp.lt.s32.totalorder %s115_s2, %s115_s2 }
  0xf4   :  { %p3240_p13 = scmp.ne.s32.totalorder %s115_s2, %s3239_s8  ;;  %p3245_p1 = scmp.lt.s32.totalorder %s3239_s8, %s3239_s8 }
  0xf6   :  { %p3246_p2 = por %p3245_p1, %p3244_p0 }
  0xf8   :  { %p3247_p3 = pnand %p3246_p2, %p3240_p13 }
  0xfa   :  { %3250 = shalt.err (!%p3247_p3)
}
  0xfb   :  { %s3532_s1 = smov 192   ;;  %s3533_s25 = smov 12  }
  0xfc   :  { %120 = dma.hbm_to_vmem [thread:$0]  %s4263_s16, 6144, %s115_s2, [#allocation12], %s3532_s1, %s3532_s1, %s3533_s25  }
  0xfd   :  { %s3534_s13 = smov [#allocation16]   ;;  %s3535_s21 = smov [#allocation19]  }
  0xfe   :  { %s138_s4 = sshll.u32 %s3534_s13, 4  ;;  %s162_s29 = sshll.u32 %s3535_s21, 4  ;;  %s139_s4 = int_to_ptr.vmem [resolvable:$true] %s138_s4  ;;  %s163_s29 = int_to_ptr.vmem [resolvable:$true] %s162_s29 }
  0xff   :  { %s3251_s26 = scalar_lea.hbm %s4213_s10, 64 }
 0x100   :  { %p3252_p4 = scmp.ne.s32.totalorder %s4213_s10, %s3251_s26  ;;  %p3255_p5 = scmp.lt.u32.totalorder %s3251_s26, %s4213_s10 }
 0x102   :  { %p3257_p6 = pnand %p3255_p5, %p3252_p4 }
 0x104   :  { %3260 = shalt.err (!%p3257_p6)
}
 0x105   :  { %s3261_s2 = scalar_lea.vmem %s139_s4, 64  ;;  %p3266_p8 = scmp.lt.s32.totalorder %s139_s4, %s139_s4 }
 0x106   :  { %p3262_p7 = scmp.ne.s32.totalorder %s139_s4, %s3261_s2  ;;  %p3267_p9 = scmp.lt.s32.totalorder %s3261_s2, %s3261_s2 }
 0x108   :  { %p3268_p10 = por %p3267_p9, %p3266_p8 }
 0x10a   :  { %p3269_p11 = pnand %p3268_p10, %p3262_p7 }
 0x10c   :  { %3272 = shalt.err (!%p3269_p11)
}
 0x10d   :  { %144 = dma.hbm_to_vmem [thread:$0]  %s4213_s10, 64, %s139_s4, [#allocation15], %s3523_s3, %s3523_s3, %s3524_s30  }
 0x10e   :  { %s3273_s0 = scalar_lea.hbm %s4215_s12, 4096 }
 0x10f   :  { %p3274_p12 = scmp.ne.s32.totalorder %s4215_s12, %s3273_s0  ;;  %p3277_p13 = scmp.lt.u32.totalorder %s3273_s0, %s4215_s12 }
 0x111   :  { %p3279_p0 = pnand %p3277_p13, %p3274_p12 }
 0x113   :  { %3282 = shalt.err (!%p3279_p0)
}
 0x114   :  { %s3283_s26 = scalar_lea.vmem %s163_s29, 4096  ;;  %p3288_p2 = scmp.lt.s32.totalorder %s163_s29, %s163_s29 }
 0x115   :  { %p3284_p1 = scmp.ne.s32.totalorder %s163_s29, %s3283_s26  ;;  %p3289_p3 = scmp.lt.s32.totalorder %s3283_s26, %s3283_s26 }
 0x117   :  { %p3290_p4 = por %p3289_p3, %p3288_p2 }
 0x119   :  { %p3291_p5 = pnand %p3290_p4, %p3284_p1 }
 0x11b   :  { %3294 = shalt.err (!%p3291_p5)
}
 0x11c   :  { %168 = dma.hbm_to_vmem [thread:$0]  %s4215_s12, 4096, %s163_s29, [#allocation18], %s4259_s11, %s4259_s11, %s3519_s9  }
 0x11d   :  { %s3536_s30 = smov [#allocation22]   ;;  %s3537_s7 = smov [#allocation25]  }
 0x11e   :  { %s187_s4 = sshll.u32 %s3536_s30, 4  ;;  %s209_s27 = sshll.u32 %s3537_s7, 4  ;;  %s188_s4 = int_to_ptr.vmem [resolvable:$true] %s187_s4  ;;  %s210_s27 = int_to_ptr.vmem [resolvable:$true] %s209_s27 }
 0x11f   :  { %s3295_s2 = scalar_lea.hbm %s4217_s14, 16 }
 0x120   :  { %p3296_p6 = scmp.ne.s32.totalorder %s4217_s14, %s3295_s2  ;;  %p3299_p7 = scmp.lt.u32.totalorder %s3295_s2, %s4217_s14 }
 0x122   :  { %p3301_p8 = pnand %p3299_p7, %p3296_p6 }
 0x124   :  { %3304 = shalt.err (!%p3301_p8)
}
 0x125   :  { %s3305_s12 = scalar_lea.vmem %s188_s4, 16  ;;  %s3309_s9 = scalar_lea.vmem %s188_s4, 32 }
 0x126   :  { %p3306_p9 = scmp.ne.s32.totalorder %s188_s4, %s3305_s12  ;;  %p3310_p10 = scmp.lt.s32.totalorder %s188_s4, %s188_s4 }
 0x127   :  { %p3311_p11 = scmp.lt.s32.totalorder %s3309_s9, %s3305_s12 }
 0x129   :  { %p3312_p12 = por %p3311_p11, %p3310_p10 }
 0x12b   :  { %p3313_p13 = pnand %p3312_p12, %p3306_p9 }
 0x12d   :  { %3316 = shalt.err (!%p3313_p13)
}
 0x12e   :  { %190 = dma.hbm_to_vmem [thread:$0]  %s4217_s14, 16, %s188_s4, [#allocation21]  }
 0x12f   :  { %s3317_s21 = scalar_lea.hbm %s4220_s17, 32 }
 0x130   :  { %p3318_p0 = scmp.ne.s32.totalorder %s4220_s17, %s3317_s21  ;;  %p3321_p1 = scmp.lt.u32.totalorder %s3317_s21, %s4220_s17 }
 0x132   :  { %p3323_p2 = pnand %p3321_p1, %p3318_p0 }
 0x134   :  { %3326 = shalt.err (!%p3323_p2)
}
 0x135   :  { %s3327_s3 = scalar_lea.vmem %s210_s27, 32  ;;  %p3332_p4 = scmp.lt.s32.totalorder %s210_s27, %s210_s27 }
 0x136   :  { %p3328_p3 = scmp.ne.s32.totalorder %s210_s27, %s3327_s3  ;;  %p3333_p5 = scmp.lt.s32.totalorder %s3327_s3, %s3327_s3 }
 0x138   :  { %p3334_p6 = por %p3333_p5, %p3332_p4 }
 0x13a   :  { %p3335_p7 = pnand %p3334_p6, %p3328_p3 }
 0x13c   :  { %3338 = shalt.err (!%p3335_p7)
}
 0x13d   :  { %212 = dma.hbm_to_vmem [thread:$0]  %s4220_s17, 32, %s210_s27, [#allocation24]  }
 0x13e   :  { %3493 = dma.done.wait [#allocation3], 128  }
 0x13f   :  { %3494 = vsyncadd [#allocation3], 4294967168 }
 0x140   :  { %3495 = dma.done.wait [#allocation6], 1040  }
 0x141   :  { %3496 = vsyncadd [#allocation6], 4294966256 }
 0x142   :  { %3497 = dma.done.wait [#allocation9], 80  }
 0x143   :  { %3498 = vsyncadd [#allocation9], 4294967216 }
 0x144   :  { %3499 = dma.done.wait [#allocation12], 6160  }
 0x145   :  { %3500 = vsyncadd [#allocation12], 4294961136 }
 0x146   :  { %3501 = dma.done.wait [#allocation15], 128  }
 0x147   :  { %3502 = vsyncadd [#allocation15], 4294967168 }
 0x148   :  { %3503 = dma.done.wait [#allocation18], 4160  }
 0x149   :  { %3504 = vsyncadd [#allocation18], 4294963136 }
 0x14a   :  { %3505 = dma.done.wait [#allocation21], 1040  }
 0x14b   :  { %3506 = vsyncadd [#allocation21], 4294966256 }
 0x14c   :  { %3507 = dma.done.wait [#allocation24], 48  }
 0x14d   :  { %3508 = vsyncadd [#allocation24], 4294967248  ;;  %v3538_v0 = vmov 0.0   ;;  %vm3539_vm0 = vmmov 0   ;;  %v2841_v1 = vld [vmem:[#allocation5] sm:$0xff]   ;;  %v2842_v2 = vld [vmem:[#allocation5 + $0x8] sm:$0xff]  }
 0x14e   :  { %2638 = vmatprep.subr.bf16.mxu0 %v3538_v0  ;;  %2654 = vmatprep.mubr.msk.bf16.mxu0 %vm3539_vm0, %v3538_v0  ;;  %v2843_v3 = vld [vmem:[#allocation5 + $0x10] sm:$0xff]   ;;  %v2844_v4 = vld [vmem:[#allocation5 + $0x18] sm:$0xff]   ;;  %v2845_v5 = vld [vmem:[#allocation5 + $0x20] sm:$0xff]   ;;  %v3540_v30 = vmov 0   ;;  %v3541_v36 = vmov 2   ;;  %s4264_s7 = sld [smem:[#allocation50_spill]] }
 0x14f   :  { %2639 = vmatpush3.bf16.msra.mxu0 %v2841_v1  ;;  %v2846_v6 = vld [vmem:[#allocation5 + $0x28] sm:$0xff]   ;;  %v2847_v7 = vld [vmem:[#allocation5 + $0x30] sm:$0xff]   ;;  %v2848_v8 = vld [vmem:[#allocation5 + $0x38] sm:$0xff]   ;;  %609 = vmatprep.mubr.bf16.mxu1 %v3540_v30  ;;  %vm732_vm1 = vcmask 1043456   ;;  %vm716_vm6 = vcmask 64512   ;;  %s4267_s8 = sld [smem:[#allocation55_spill]] }
 0x150   :  { %2640 = vmatprep.subr.bf16.mxu0 %v3538_v0  ;;  %v263_v9 = vld [vmem:[#allocation2] sm:$0xff]  ;;  %v2853_v14 = vld [vmem:[#allocation13 + $0x1c] ss:$12 sps:$4 sm:$0xff]   ;;  %v2855_v15 = vld [vmem:[#allocation13 + $0x18] ss:$12 sps:$4 sm:$0xff]   ;;  %2835 = vset.pattern.permute.xlu0 %v3541_v36  ;;  %vm1802_vm13 = vcmask 1040384  }
 0x151   :  { %v264_v10 = vpack.c.bf16 %v263_v9, %v263_v9  ;;  %v2849_v11 = vld [vmem:[#allocation13 + $0x4] ss:$12 sps:$4 sm:$0xff]   ;;  %v2851_v12 = vld [vmem:[#allocation13] ss:$12 sps:$4 sm:$0xff]   ;;  %v2852_v13 = vld [vmem:[#allocation13 + $0x8] ss:$12 sps:$4 sm:$0xff]  }
 0x152   :  { %577 = vmatprep.subr.bf16.mxu1 %v2849_v11  ;;  %v2856_v16 = vld [vmem:[#allocation13 + $0x20] ss:$12 sps:$4 sm:$0xff]   ;;  %v2859_v18 = vld [vmem:[#allocation13 + $0x30] ss:$12 sps:$4 sm:$0xff]   ;;  %v2860_v19 = vld [vmem:[#allocation13 + $0x38] ss:$12 sps:$4 sm:$0xff]  }
 0x153   :  { %2641 = vmatpush3.bf16.msra.mxu0 %v2842_v2  ;;  %578 = vmatpush1.bf16.msra.mxu1 %v2851_v12  ;;  %v2857_v17 = vld [vmem:[#allocation13 + $0x34] ss:$12 sps:$4 sm:$0xff]   ;;  %v2861_v20 = vld [vmem:[#allocation13 + $0x4c] ss:$12 sps:$4 sm:$0xff]   ;;  %v2864_v22 = vld [vmem:[#allocation13 + $0x50] ss:$12 sps:$4 sm:$0xff]  }
 0x154   :  { %2642 = vmatprep.subr.bf16.mxu0 %v3538_v0  ;;  %579 = vmatprep.subr.bf16.mxu1 %v2853_v14  ;;  %v2863_v21 = vld [vmem:[#allocation13 + $0x48] ss:$12 sps:$4 sm:$0xff]   ;;  %v2865_v23 = vld [vmem:[#allocation13 + $0x64] ss:$12 sps:$4 sm:$0xff]   ;;  %v2867_v24 = vld [vmem:[#allocation13 + $0x60] ss:$12 sps:$4 sm:$0xff]  }
 0x155   :  { %v2868_v25 = vld [vmem:[#allocation13 + $0x68] ss:$12 sps:$4 sm:$0xff]   ;;  %v2871_v27 = vld [vmem:[#allocation13 + $0x78] ss:$12 sps:$4 sm:$0xff]   ;;  %v2872_v28 = vld [vmem:[#allocation13 + $0x80] ss:$12 sps:$4 sm:$0xff]  }
 0x156   :  { %v2869_v26 = vld [vmem:[#allocation13 + $0x7c] ss:$12 sps:$4 sm:$0xff]   ;;  %v2873_v29 = vld [vmem:[#allocation13 + $0x94] ss:$12 sps:$4 sm:$0xff]   ;;  %v2876_v32 = vld [vmem:[#allocation13 + $0x98] ss:$12 sps:$4 sm:$0xff]  }
 0x157   :  { %2643 = vmatpush3.bf16.msra.mxu0 %v2843_v3  ;;  %580 = vmatpush1.bf16.msra.mxu1 %v2855_v15  ;;  %v2875_v31 = vld [vmem:[#allocation13 + $0x90] ss:$12 sps:$4 sm:$0xff]   ;;  %v2877_v33 = vld [vmem:[#allocation13 + $0xac] ss:$12 sps:$4 sm:$0xff]   ;;  %v2879_v34 = vld [vmem:[#allocation13 + $0xa8] ss:$12 sps:$4 sm:$0xff]  }
 0x158   :  { %2644 = vmatprep.subr.bf16.mxu0 %v3538_v0  ;;  %581 = vmatprep.subr.bf16.mxu1 %v2857_v17  ;;  %v2880_v35 = vld [vmem:[#allocation13 + $0xb0] ss:$12 sps:$4 sm:$0xff]   ;;  %v2391_v37 = vld [vmem:[%s4264_s7] ss:$0 sm:$0xff]  ;;  %v2400_v60 = vld [vmem:[#allocation7] ss:$0 sm:$0xff] }
 0x159   :  { %v2401_v63 = vld [vmem:[#allocation8] ss:$0 sm:$0xff]  ;;  %v3542_v15 = vmov 3   ;;  %vm2273_vm14 = vcmask 1041408   ;;  %s3544_s29 = smov [#allocation30]  }
 0x15a   :  { %s2324_s0 = sshll.u32 %s3544_s29, 4  ;;  %s2325_s0 = int_to_ptr.vmem [resolvable:$true] %s2324_s0 }
 0x15b   :  { %2645 = vmatpush3.bf16.msra.mxu0 %v2844_v4  ;;  %582 = vmatpush1.bf16.msra.mxu1 %v2859_v18  ;;  %v413_v18 = vld [vmem:[#allocation10] sm:$0xf] }
 0x15c   :  { %2646 = vmatprep.subr.bf16.mxu0 %v3538_v0  ;;  %583 = vmatprep.subr.bf16.mxu1 %v2861_v20  ;;  %vm414_vm2 = vcmp.gt.bf16.partialorder %v413_v18, 0  ;;  %v2899_v18 = vld [vmem:[#allocation13 + $0xc4] ss:$12 sps:$4 sm:$0xff]  }
 0x15f   :  { %2647 = vmatpush3.bf16.msra.mxu0 %v2845_v5  ;;  %584 = vmatpush1.bf16.msra.mxu1 %v2863_v21 }
 0x160   :  { %2648 = vmatprep.subr.bf16.mxu0 %v3538_v0  ;;  %585 = vmatprep.subr.bf16.mxu1 %v2865_v23  ;;  %v712_v23 = vsel %vm414_vm2, 65537, %v3540_v30 }
 0x163   :  { %2649 = vmatpush3.bf16.msra.mxu0 %v2846_v6  ;;  %586 = vmatpush1.bf16.msra.mxu1 %v2867_v24 }
 0x164   :  { %2650 = vmatprep.subr.bf16.mxu0 %v3538_v0  ;;  %587 = vmatprep.subr.bf16.mxu1 %v2869_v26 }
 0x167   :  { %2651 = vmatpush3.bf16.msra.mxu0 %v2847_v7  ;;  %588 = vmatpush1.bf16.msra.mxu1 %v2871_v27  ;;  %v713_v27 = vunpack.c.l.b16 %v712_v23  ;;  %v2907_v23 = vld [vmem:[#allocation13 + $0xf4] ss:$12 sps:$4 sm:$0xff]  }
 0x168   :  { %2652 = vmatprep.subr.bf16.mxu0 %v3538_v0  ;;  %589 = vmatprep.subr.bf16.mxu1 %v2873_v29 }
 0x169   :  { %vm3930_vm5 = vcmp.ne.s32.totalorder %v713_v27, 0  ;;  %v2915_v27 = vld [vmem:[#allocation13 + $0x124] ss:$12 sps:$4 sm:$0xff]  }
 0x16b   :  { %2653 = vmatpush3.bf16.msra.mxu0 %v2848_v8  ;;  %590 = vmatpush1.bf16.msra.mxu1 %v2875_v31 }
 0x16c   :  { %2658 = vmatprep.subr.bf16.mxu0 %v3538_v0  ;;  %591 = vmatprep.subr.bf16.mxu1 %v2877_v33 }
 0x16e   :  { %2655 = vmatmul.mubr.bf16.vlgmr.msra.gmra.mrb[0].mxu0 %v264_v10 }
 0x16f   :  { %2674 = vmatprep.mubr.msk.bf16.mxu0 %vm3539_vm0, %v3538_v0  ;;  %2659 = vmatpush3.bf16.msra.mxu0 %v2852_v13 }
 0x170   :  { %2660 = vmatprep.subr.bf16.mxu0 %v3538_v0  ;;  %592 = vmatpush1.bf16.msra.mxu1 %v2879_v34 }
 0x171   :  { %2678 = vmatprep.subr.bf16.mxu1 %v3538_v0 }
 0x173   :  { %2661 = vmatpush3.bf16.msra.mxu0 %v2856_v16  ;;  %v697_v16 = vlaneseq }
 0x174   :  { %2662 = vmatprep.subr.bf16.mxu0 %v3538_v0 }
 0x175   :  { %v698_v17 = vshrl.u32 %v697_v16, 7  ;;  %v2896_v16 = vld [vmem:[#allocation19 + $0x38] sm:$0xff]  }
 0x177   :  { %2663 = vmatpush3.bf16.msra.mxu0 %v2860_v19  ;;  %v3921_v19 = vsub.s32 0, %v698_v17  ;;  %v3923_v21 = vsub.s32 1, %v698_v17  ;;  %v2897_v17 = vld [vmem:[#allocation13 + $0xc0] ss:$12 sps:$4 sm:$0xff]  }
 0x178   :  { %2664 = vmatprep.subr.bf16.mxu0 %v3538_v0 }
 0x17b   :  { %2665 = vmatpush3.bf16.msra.mxu0 %v2864_v22 }
 0x17c   :  { %2666 = vmatprep.subr.bf16.mxu0 %v3538_v0 }
 0x17f   :  { %2667 = vmatpush3.bf16.msra.mxu0 %v2868_v25 }
 0x180   :  { %2668 = vmatprep.subr.bf16.mxu0 %v3538_v0 }
 0x183   :  { %2669 = vmatpush3.bf16.msra.mxu0 %v2872_v28 }
 0x184   :  { %2670 = vmatprep.subr.bf16.mxu0 %v3538_v0 }
 0x187   :  { %2671 = vmatpush3.bf16.msra.mxu0 %v2876_v32  ;;  %v3928_v32 = vld [vmem:[#allocation11] ss:$0 sm:$0xff] }
 0x188   :  { %2672 = vmatprep.subr.bf16.mxu0 %v3538_v0 }
 0x18b   :  { %2673 = vmatpush3.bf16.msra.mxu0 %v2880_v35 }
 0x18c   :  { %1260 = vmatprep.subr.bf16.mxu0 %v2899_v18 }
 0x241   :  { %v370_v38 = vpop.f32.mrb[0].mxu0 }
 0x242   :  { %v371_v39 = vadd.f32 %v2391_v37, %v370_v38  ;;  %v2656_v40 = vpop.f32.mrb[1].mxu0 }
 0x243   :  { %v373_v41 = vpop.f32.mrb[2].mxu0 }
 0x244   :  { %v378_v42 = vrot.slane %v371_v39, 4  ;;  %v2657_v43 = vpop.f32.mrb[3].mxu0 }
 0x246   :  { %v379_v44 = vadd.f32 %v378_v42, %v371_v39 }
 0x248   :  { %v380_v45 = vrot.slane %v379_v44, 2 }
 0x24a   :  { %v381_v46 = vadd.f32 %v380_v45, %v379_v44 }
 0x24c   :  { %v382_v47 = vrot.slane %v381_v46, 1 }
 0x24e   :  { %v383_v48 = vadd.f32 %v382_v47, %v381_v46 }
 0x250   :  { %v385_v49 = vmul.f32 0.125, %v383_v48 }
 0x252   :  { %v386_v50 = vsub.f32 %v371_v39, %v385_v49 }
 0x254   :  { %v387_v51 = vmul.f32 %v386_v50, %v386_v50  ;;  %v401_v61 = vmul.f32 %v2400_v60, %v386_v50 }
 0x256   :  { %v388_v52 = vrot.slane %v387_v51, 4 }
 0x258   :  { %v389_v53 = vadd.f32 %v388_v52, %v387_v51 }
 0x25a   :  { %v390_v54 = vrot.slane %v389_v53, 2 }
 0x25c   :  { %v391_v55 = vadd.f32 %v390_v54, %v389_v53 }
 0x25e   :  { %v392_v56 = vrot.slane %v391_v55, 1 }
 0x260   :  { %v393_v57 = vadd.f32 %v392_v56, %v391_v55 }
 0x262   :  { %v394_v58 = vmul.f32 0.125, %v393_v57 }
 0x264   :  { %v402_v59 = vadd.f32 1e-05, %v394_v58 }
 0x266   :  { %2977 = vrsqrt.f32 %v402_v59 }
 0x270   :  { %v2978_v62 = vpop.eup %2977 }
 0x271   :  { %v404_v1 = vmul.f32 %v2978_v62, %v401_v61 }
 0x273   :  { %v411_v2 = vadd.f32 %v2401_v63, %v404_v1  ;;  %v2881_v63 = vld [vmem:[#allocation19 + $0x40] sm:$0xff]  }
 0x274   :  { %v2882_v1 = vld [vmem:[#allocation19] sm:$0xff]  }
 0x275   :  { %v3910_v3 = vmax.f32 %v411_v2, 0.0  ;;  %v2883_v2 = vld [vmem:[#allocation19 + $0x48] sm:$0xff]  }
 0x277   :  { %v416_v4 = vpack.c.bf16 %v3910_v3, %v3910_v3 }
 0x279   :  { %610 = vmatmul.mubr.bf16.vlgmr.msra.gmra.mrb[0].mxu1 %v416_v4  ;;  %2675 = vmatmul.mubr.bf16.vlgmr.msra.gmra.mrb[4].mxu0 %v416_v4  ;;  %v2884_v4 = vld [vmem:[#allocation19 + $0x8] sm:$0xff]  }
 0x27a   :  { %2680 = vmatprep.mubr.msk.bf16.mxu1 %vm3539_vm0, %v3538_v0  ;;  %1292 = vmatprep.mubr.bf16.mxu0 %v3540_v30 }
 0x27b   :  { %1261 = vmatpush1.bf16.msra.mxu0 %v2897_v17 }
 0x34c   :  { %v611_v5 = vpop.f32.mrb[0].mxu1  ;;  %v652_v6 = vpop.f32.mrb[4].mxu0 }
 0x34d   :  { %v658_v7 = vpack.c.bf16 %v611_v5, %v611_v5  ;;  %v3917_v8 = vpop.f32.mrb[1].mxu1  ;;  %660 = vxpose.xlu1.b32.start.end [1/1] (short) (narrow) %v652_v6, 8  ;;  %694 = vperm.xlu0 %2835, %v652_v6   ;;  %v2676_v9 = vpop.f32.mrb[5].mxu0  ;;  %v2885_v5 = vld [vmem:[#allocation19 + $0x50] sm:$0xff]  }
 0x34e   :  { %v615_v10 = vpop.f32.mrb[2].mxu1  ;;  %v655_v11 = vpop.f32.mrb[6].mxu0  ;;  %v659_v56 = vpack.c.bf16 %v3917_v8, %v3917_v8  ;;  %v2888_v8 = vld [vmem:[#allocation19 + $0x18] sm:$0xff]   ;;  %v2889_v9 = vld [vmem:[#allocation19 + $0x60] sm:$0xff]  }
 0x34f   :  { %v734_v12 = vsel %vm732_vm1, %v658_v7, 0  ;;  %v616_v13 = vpop.f32.mrb[3].mxu1  ;;  %v2677_v14 = vpop.f32.mrb[7].mxu0  ;;  %v2887_v7 = vld [vmem:[#allocation19 + $0x58] sm:$0xff]   ;;  %v2890_v10 = vld [vmem:[#allocation19 + $0x20] sm:$0xff]   ;;  %v2891_v11 = vld [vmem:[#allocation19 + $0x68] sm:$0xff]  }
 0x350   :  { %2679 = vmatpush3.bf16.msra.mxu1 %v734_v12  ;;  %v806_v60 = vsel %vm732_vm1, %v659_v56, 0  ;;  %v2892_v12 = vld [vmem:[#allocation19 + $0x28] sm:$0xff]   ;;  %v2893_v13 = vld [vmem:[#allocation19 + $0x70] sm:$0xff]  }
 0x351   :  { %2836 = vset.pattern.permute.xlu0 %v3542_v15  ;;  %2684 = vmatprep.subr.bf16.mxu1 %v3538_v0  ;;  %v2894_v14 = vld [vmem:[#allocation19 + $0x30] sm:$0xff]  }
 0x352   :  { %777 = vperm.xlu0 %2836, %v652_v6   ;;  %v2886_v6 = vld [vmem:[#allocation19 + $0x10] sm:$0xff]  }
 0x356   :  { %2837 = vset.pattern.permute.xlu0 %v3541_v36 }
 0x36b   :  { %2838 = vset.pattern.permute.xlu1 %v3542_v15  ;;  %v2895_v15 = vld [vmem:[#allocation19 + $0x78] sm:$0xff]  }
 0x3cc   :  { %v695_v20 = vpop.permute.xlu0 %694 }
 0x3cd   :  { %v676_v22 = vpop.trf.xlu1 }
 0x3ce   :  { %v700_v24 = vrot.slane %v676_v22, %v3921_v19  ;;  %v783_v26 = vrot.slane %v676_v22, %v3923_v21  ;;  %v2901_v22 = vld [vmem:[#allocation13 + $0xd8] ss:$12 sps:$4 sm:$0xff]  }
 0x3d0   :  { %v701_v25 = vadd.f32 %v700_v24, %v695_v20  ;;  %v2903_v20 = vld [vmem:[#allocation13 + $0xdc] ss:$12 sps:$4 sm:$0xff]  }
 0x3d1   :  { %v778_v28 = vpop.permute.xlu0 %777  ;;  %1262 = vmatprep.subr.bf16.mxu0 %v2903_v20  ;;  %v2905_v24 = vld [vmem:[#allocation13 + $0xf0] ss:$12 sps:$4 sm:$0xff]   ;;  %v862_v20 = vld [vmem:[#allocation16] sm:$0x3] }
 0x3d2   :  { %v703_v29 = vmul.f32 0.01, %v701_v25  ;;  %v784_v31 = vadd.f32 %v783_v26, %v778_v28  ;;  %vm702_vm3 = vcmp.gt.f32.partialorder %v701_v25, 0.0  ;;  %1263 = vmatpush1.bf16.msra.mxu0 %v2901_v22  ;;  %v2909_v26 = vld [vmem:[#allocation13 + $0x108] ss:$12 sps:$4 sm:$0xff]   ;;  %v900_v22 = vrot.slane %v862_v20, %v3921_v19 }
 0x3d3   :  { %1264 = vmatprep.subr.bf16.mxu0 %v2907_v23  ;;  %v2913_v28 = vld [vmem:[#allocation13 + $0x120] ss:$12 sps:$4 sm:$0xff]  }
 0x3d4   :  { %vm785_vm4 = vcmp.gt.f32.partialorder %v784_v31, 0.0  ;;  %v786_v33 = vmul.f32 0.01, %v784_v31  ;;  %v704_v34 = vsel %vm702_vm3, %v701_v25, %v703_v29  ;;  %v2911_v25 = vld [vmem:[#allocation13 + $0x10c] ss:$12 sps:$4 sm:$0xff]  }
 0x3d5   :  { %v711_v36 = vmul.f32 %v3928_v32, %v704_v34  ;;  %v2919_v29 = vld [vmem:[#allocation13 + $0x13c] ss:$12 sps:$4 sm:$0xff]  }
 0x3d6   :  { %v787_v37 = vsel %vm785_vm4, %v784_v31, %v786_v33  ;;  %1265 = vmatpush1.bf16.msra.mxu0 %v2905_v24  ;;  %v2917_v31 = vld [vmem:[#allocation13 + $0x138] ss:$12 sps:$4 sm:$0xff]   ;;  %v848_v33 = vld [vmem:[#allocation14] sm:$0x3]  ;;  %v904_v24 = vrot.slane %v862_v20, %v3923_v21 }
 0x3d7   :  { %v715_v38 = vsel %vm3930_vm5, %v711_v36, -1e+30  ;;  %v788_v39 = vmul.f32 %v3928_v32, %v787_v37  ;;  %1266 = vmatprep.subr.bf16.mxu0 %v2911_v25  ;;  %v853_v34 = vrot.slane %v848_v33, %v3921_v19  ;;  %v863_v25 = vld [vmem:[#allocation17] sm:$0x3] }
 0x3d8   :  { %v717_v40 = vsel %vm716_vm6, %v715_v38, -inf }
 0x3d9   :  { %718 = vmax.xlane.f32.xlu1 %v717_v40  ;;  %v789_v41 = vsel %vm3930_vm5, %v788_v39, -1e+30 }
 0x3da   :  { %v790_v42 = vsel %vm716_vm6, %v789_v41, -inf  ;;  %1267 = vmatpush1.bf16.msra.mxu0 %v2909_v26 }
 0x3db   :  { %791 = vmax.xlane.f32.xlu0 %v790_v42  ;;  %1268 = vmatprep.subr.bf16.mxu0 %v2915_v27 }
 0x3de   :  { %1269 = vmatpush1.bf16.msra.mxu0 %v2913_v28  ;;  %v919_v28 = vrot.slane %v863_v25, %v3921_v19 }
 0x3df   :  { %1270 = vmatprep.subr.bf16.mxu0 %v2919_v29 }
 0x3e2   :  { %1271 = vmatpush1.bf16.msra.mxu0 %v2917_v31  ;;  %v923_v31 = vrot.slane %v863_v25, %v3923_v21 }
 0x466   :  { %v719_v43 = vpop.xlane.xlu1 %718 }
 0x467   :  { %v720_v44 = vsub.f32 %v715_v38, %v719_v43  ;;  %v857_v43 = vrot.slane %v848_v33, %v3923_v21 }
 0x468   :  { %v792_v45 = vpop.xlane.xlu0 %791 }
 0x469   :  { %v721_v46 = vmul.f32 1.442695, %v720_v44  ;;  %v793_v47 = vsub.f32 %v789_v41, %v792_v45 }
 0x46b   :  { %2979 = vpow2.f32 %v721_v46  ;;  %v794_v48 = vmul.f32 1.442695, %v793_v47 }
 0x46d   :  { %2981 = vpow2.f32 %v794_v48 }
 0x475   :  { %v2980_v49 = vpop.eup %2979 }
 0x476   :  { %v723_v50 = vsel %vm716_vm6, %v2980_v49, 0.0 }
 0x477   :  { %v2982_v51 = vpop.eup %2981  ;;  %724 = vadd.xlane.f32.xlu0 %v723_v50 }
 0x478   :  { %v796_v52 = vsel %vm716_vm6, %v2982_v51, 0.0 }
 0x479   :  { %797 = vadd.xlane.f32.xlu1 %v796_v52 }
 0x504   :  { %v725_v53 = vpop.xlane.xlu0 %724 }
 0x505   :  { %2983 = vrcp.f32 %v725_v53 }
 0x506   :  { %v798_v54 = vpop.xlane.xlu1 %797 }
 0x507   :  { %2985 = vrcp.f32 %v798_v54 }
 0x50f   :  { %v2984_v55 = vpop.eup %2983 }
 0x510   :  { %v727_v57 = vmul.f32 %v2984_v55, %v2980_v49 }
 0x511   :  { %v2986_v59 = vpop.eup %2985 }
 0x512   :  { %v728_v58 = vpack.c.bf16 %v727_v57, %v727_v57  ;;  %v800_v61 = vmul.f32 %v2986_v59, %v2982_v51 }
 0x514   :  { %2681 = vmatmul.mubr.msk.bf16.vlgmr.msra.gmra.mrb[4].mxu1 %vm716_vm6, %v728_v58  ;;  %v801_v62 = vpack.c.bf16 %v800_v61, %v800_v61 }
 0x515   :  { %2685 = vmatpush3.bf16.msra.mxu1 %v806_v60  ;;  %2686 = vmatprep.mubr.msk.bf16.mxu1 %vm3539_vm0, %v3538_v0 }
 0x516   :  { %2545 = vmatprep.subr.bf16.mxu1 %v2881_v63 }
 0x51c   :  { %2687 = vmatmul.mubr.msk.bf16.vlgmr.msra.gmra.mrb[8].mxu1 %vm716_vm6, %v801_v62 }
 0x51d   :  { %2546 = vmatpush3.bf16.msra.mxu1 %v2882_v1 }
 0x51e   :  { %2547 = vmatprep.subr.bf16.mxu1 %v2883_v2 }
 0x521   :  { %2548 = vmatpush3.bf16.msra.mxu1 %v2884_v4 }
 0x522   :  { %2549 = vmatprep.subr.bf16.mxu1 %v2885_v5 }
 0x525   :  { %2550 = vmatpush3.bf16.msra.mxu1 %v2886_v6 }
 0x526   :  { %2551 = vmatprep.subr.bf16.mxu1 %v2887_v7 }
 0x529   :  { %2552 = vmatpush3.bf16.msra.mxu1 %v2888_v8 }
 0x52a   :  { %2553 = vmatprep.subr.bf16.mxu1 %v2889_v9 }
 0x52d   :  { %2554 = vmatpush3.bf16.msra.mxu1 %v2890_v10 }
 0x52e   :  { %2555 = vmatprep.subr.bf16.mxu1 %v2891_v11 }
 0x531   :  { %2556 = vmatpush3.bf16.msra.mxu1 %v2892_v12 }
 0x532   :  { %2557 = vmatprep.subr.bf16.mxu1 %v2893_v13 }
 0x535   :  { %2558 = vmatpush3.bf16.msra.mxu1 %v2894_v14 }
 0x536   :  { %2559 = vmatprep.subr.bf16.mxu1 %v2895_v15 }
 0x539   :  { %2560 = vmatpush3.bf16.msra.mxu1 %v2896_v16 }
 0x53a   :  { %2690 = vmatprep.subr.bf16.mxu1 %v3538_v0 }
 0x5e7   :  { %v770_v36 = vpop.f32.mrb[4].mxu1 }
 0x5e8   :  { %v860_v37 = vadd.f32 %v853_v34, %v770_v36  ;;  %v2682_v38 = vpop.f32.mrb[5].mxu1 }
 0x5e9   :  { %v773_v39 = vpop.f32.mrb[6].mxu1 }
 0x5ea   :  { %v864_v40 = vrot.slane %v860_v37, 4  ;;  %v2683_v41 = vpop.f32.mrb[7].mxu1  ;;  %v2900_v39 = vld [vmem:[#allocation13 + $0xc8] ss:$12 sps:$4 sm:$0xff]  }
 0x5eb   :  { %v2904_v41 = vld [vmem:[#allocation13 + $0xe0] ss:$12 sps:$4 sm:$0xff]  }
 0x5ec   :  { %v865_v42 = vadd.f32 %v864_v40, %v860_v37 }
 0x5ee   :  { %v866_v44 = vrot.slane %v865_v42, 2 }
 0x5ef   :  { %v842_v45 = vpop.f32.mrb[8].mxu1 }
 0x5f0   :  { %v867_v46 = vadd.f32 %v866_v44, %v865_v42  ;;  %v861_v47 = vadd.f32 %v857_v43, %v842_v45  ;;  %v2688_v48 = vpop.f32.mrb[9].mxu1  ;;  %v2908_v42 = vld [vmem:[#allocation13 + $0xf8] ss:$12 sps:$4 sm:$0xff]   ;;  %v2912_v43 = vld [vmem:[#allocation13 + $0x110] ss:$12 sps:$4 sm:$0xff]  }
 0x5f1   :  { %v845_v49 = vpop.f32.mrb[10].mxu1  ;;  %v2916_v44 = vld [vmem:[#allocation13 + $0x128] ss:$12 sps:$4 sm:$0xff]   ;;  %v2920_v45 = vld [vmem:[#allocation13 + $0x140] ss:$12 sps:$4 sm:$0xff]  }
 0x5f2   :  { %v868_v50 = vrot.slane %v867_v46, 1  ;;  %v870_v51 = vrot.slane %v861_v47, 4  ;;  %v2689_v52 = vpop.f32.mrb[11].mxu1  ;;  %v2924_v48 = vld [vmem:[#allocation13 + $0x158] ss:$12 sps:$4 sm:$0xff]  }
 0x5f3   :  { %v2927_v49 = vld [vmem:[#allocation13 + $0x16c] ss:$12 sps:$4 sm:$0xff]  }
 0x5f4   :  { %v869_v53 = vadd.f32 %v868_v50, %v867_v46  ;;  %v871_v54 = vadd.f32 %v870_v51, %v861_v47  ;;  %v2923_v46 = vld [vmem:[#allocation13 + $0x154] ss:$12 sps:$4 sm:$0xff]   ;;  %v2928_v51 = vld [vmem:[#allocation13 + $0x170] ss:$12 sps:$4 sm:$0xff]  }
 0x5f5   :  { %1272 = vmatprep.subr.bf16.mxu0 %v2923_v46  ;;  %v2925_v50 = vld [vmem:[#allocation13 + $0x168] ss:$12 sps:$4 sm:$0xff]   ;;  %v2929_v46 = vld [vmem:[#allocation19 + $0xc0] sm:$0xff]  }
 0x5f6   :  { %v876_v55 = vmul.f32 0.125, %v869_v53  ;;  %v872_v56 = vrot.slane %v871_v54, 2 }
 0x5f8   :  { %v878_v57 = vsub.f32 %v860_v37, %v876_v55  ;;  %v873_v58 = vadd.f32 %v872_v56, %v871_v54 }
 0x5fa   :  { %v880_v59 = vmul.f32 %v878_v57, %v878_v57  ;;  %v874_v60 = vrot.slane %v873_v58, 1  ;;  %v907_v26 = vmul.f32 %v900_v22, %v878_v57 }
 0x5fc   :  { %v882_v61 = vrot.slane %v880_v59, 4  ;;  %v875_v62 = vadd.f32 %v874_v60, %v873_v58 }
 0x5fe   :  { %v883_v63 = vadd.f32 %v882_v61, %v880_v59  ;;  %v877_v1 = vmul.f32 0.125, %v875_v62 }
 0x600   :  { %v884_v2 = vrot.slane %v883_v63, 2  ;;  %v879_v4 = vsub.f32 %v861_v47, %v877_v1  ;;  %v2921_v47 = vld [vmem:[#allocation13 + $0x150] ss:$12 sps:$4 sm:$0xff]  }
 0x601   :  { %1273 = vmatpush1.bf16.msra.mxu0 %v2921_v47  ;;  %v2930_v47 = vld [vmem:[#allocation19 + $0x80] sm:$0xff]  }
 0x602   :  { %v885_v5 = vadd.f32 %v884_v2, %v883_v63  ;;  %v881_v6 = vmul.f32 %v879_v4, %v879_v4  ;;  %v908_v29 = vmul.f32 %v904_v24, %v879_v4  ;;  %1274 = vmatprep.subr.bf16.mxu0 %v2927_v49  ;;  %v2932_v49 = vld [vmem:[#allocation19 + $0x88] sm:$0xff]  }
 0x604   :  { %v886_v7 = vrot.slane %v885_v5, 1  ;;  %v888_v8 = vrot.slane %v881_v6, 4 }
 0x605   :  { %1275 = vmatpush1.bf16.msra.mxu0 %v2925_v50  ;;  %v2933_v50 = vld [vmem:[#allocation19 + $0xd0] sm:$0xff]  }
 0x606   :  { %v887_v9 = vadd.f32 %v886_v7, %v885_v5  ;;  %v889_v10 = vadd.f32 %v888_v8, %v881_v6  ;;  %2580 = vmatprep.subr.bf16.mxu0 %v2929_v46 }
 0x608   :  { %v894_v11 = vmul.f32 0.125, %v887_v9  ;;  %v890_v12 = vrot.slane %v889_v10, 2 }
 0x60a   :  { %v891_v13 = vadd.f32 %v890_v12, %v889_v10  ;;  %v909_v14 = vadd.f32 1e-05, %v894_v11 }
 0x60c   :  { %v892_v15 = vrot.slane %v891_v13, 1  ;;  %2987 = vrsqrt.f32 %v909_v14 }
 0x60e   :  { %v893_v16 = vadd.f32 %v892_v15, %v891_v13 }
 0x610   :  { %v895_v17 = vmul.f32 0.125, %v893_v16 }
 0x612   :  { %v910_v18 = vadd.f32 1e-05, %v895_v17 }
 0x614   :  { %2989 = vrsqrt.f32 %v910_v18 }
 0x616   :  { %v2988_v23 = vpop.eup %2987 }
 0x617   :  { %v913_v27 = vmul.f32 %v2988_v23, %v907_v26 }
 0x619   :  { %v926_v36 = vadd.f32 %v919_v28, %v913_v27 }
 0x61b   :  { %v928_v40 = vpack.c.bf16 %v926_v36, %v926_v36 }
 0x61e   :  { %v2990_v33 = vpop.eup %2989 }
 0x61f   :  { %v914_v34 = vmul.f32 %v2990_v33, %v908_v29 }
 0x621   :  { %v927_v37 = vadd.f32 %v923_v31, %v914_v34 }
 0x623   :  { %v929_v38 = vpack.c.bf16 %v927_v37, %v927_v37 }
 0x625   :  { %1090 = vmatprep.mubr.bf16.mxu1 %v929_v38 }
 0x626   :  { %1091 = vmatmul.mubr.bf16.vlgmr.msra.gmra.mrb[12].mxu1 %v928_v40 }
 0x627   :  { %2691 = vmatpush3.bf16.msra.mxu1 %v2900_v39  ;;  %2706 = vmatprep.mubr.msk.bf16.mxu1 %vm3539_vm0, %v3538_v0 }
 0x628   :  { %2692 = vmatprep.subr.bf16.mxu1 %v3538_v0 }
 0x62b   :  { %2693 = vmatpush3.bf16.msra.mxu1 %v2904_v41 }
 0x62c   :  { %2694 = vmatprep.subr.bf16.mxu1 %v3538_v0 }
 0x62f   :  { %2695 = vmatpush3.bf16.msra.mxu1 %v2908_v42 }
 0x630   :  { %2696 = vmatprep.subr.bf16.mxu1 %v3538_v0 }
 0x633   :  { %2697 = vmatpush3.bf16.msra.mxu1 %v2912_v43 }
 0x634   :  { %2698 = vmatprep.subr.bf16.mxu1 %v3538_v0 }
 0x637   :  { %2699 = vmatpush3.bf16.msra.mxu1 %v2916_v44 }
 0x638   :  { %2700 = vmatprep.subr.bf16.mxu1 %v3538_v0 }
 0x63b   :  { %2701 = vmatpush3.bf16.msra.mxu1 %v2920_v45 }
 0x63c   :  { %2702 = vmatprep.subr.bf16.mxu1 %v3538_v0 }
 0x63f   :  { %2703 = vmatpush3.bf16.msra.mxu1 %v2924_v48  ;;  %v2931_v48 = vld [vmem:[#allocation19 + $0xc8] sm:$0xff]  }
 0x640   :  { %2704 = vmatprep.subr.bf16.mxu1 %v3538_v0 }
 0x643   :  { %2705 = vmatpush3.bf16.msra.mxu1 %v2928_v51  ;;  %v2934_v51 = vld [vmem:[#allocation19 + $0x90] sm:$0xff]  }
 0x644   :  { %2710 = vmatprep.subr.bf16.mxu1 %v3538_v0 }
 0x6f9   :  { %v2561_v52 = vpop.f32.mrb[12].mxu1 }
 0x6fa   :  { %v2562_v53 = vpop.f32.mrb[13].mxu1 }
 0x6fb   :  { %v2563_v54 = vadd.f32 %v2562_v53, %v2561_v52  ;;  %v2564_v55 = vpop.f32.mrb[14].mxu1  ;;  %v2935_v52 = vld [vmem:[#allocation19 + $0xd8] sm:$0xff]  }
 0x6fc   :  { %v2565_v56 = vpop.f32.mrb[15].mxu1  ;;  %v2936_v53 = vld [vmem:[#allocation19 + $0x98] sm:$0xff]   ;;  %v2938_v55 = vld [vmem:[#allocation19 + $0xa0] sm:$0xff]  }
 0x6fd   :  { %v3969_v57 = vadd.f32 %v2563_v54, %v3910_v3  ;;  %v2937_v54 = vld [vmem:[#allocation19 + $0xe0] sm:$0xff]   ;;  %v2939_v56 = vld [vmem:[#allocation19 + $0xe8] sm:$0xff]  }
 0x6ff   :  { %v1098_v58 = vpack.c.bf16 %v3969_v57, %v3969_v57 }
 0x701   :  { %1293 = vmatmul.mubr.bf16.vlgmr.msra.gmra.mrb[8].mxu0 %v1098_v58  ;;  %2707 = vmatmul.mubr.bf16.vlgmr.msra.gmra.mrb[16].mxu1 %v1098_v58  ;;  %v2940_v58 = vld [vmem:[#allocation19 + $0xa8] sm:$0xff]  }
 0x702   :  { %2712 = vmatprep.mubr.msk.bf16.mxu1 %vm3539_vm0, %v3538_v0  ;;  %2581 = vmatpush3.bf16.msra.mxu0 %v2930_v47 }
 0x703   :  { %2582 = vmatprep.subr.bf16.mxu0 %v2931_v48 }
 0x706   :  { %2583 = vmatpush3.bf16.msra.mxu0 %v2932_v49 }
 0x707   :  { %2584 = vmatprep.subr.bf16.mxu0 %v2933_v50 }
 0x70a   :  { %2585 = vmatpush3.bf16.msra.mxu0 %v2934_v51 }
 0x70b   :  { %2586 = vmatprep.subr.bf16.mxu0 %v2935_v52 }
 0x70e   :  { %2587 = vmatpush3.bf16.msra.mxu0 %v2936_v53 }
 0x70f   :  { %2588 = vmatprep.subr.bf16.mxu0 %v2937_v54 }
 0x712   :  { %2589 = vmatpush3.bf16.msra.mxu0 %v2938_v55  ;;  %v1536_v55 = vld [vmem:[#allocation16 + $0x2] sm:$0x3] }
 0x713   :  { %2590 = vmatprep.subr.bf16.mxu0 %v2939_v56  ;;  %v1575_v56 = vrot.slane %v1536_v55, %v3921_v19 }
 0x716   :  { %2591 = vmatpush3.bf16.msra.mxu0 %v2940_v58 }
 0x7d4   :  { %v1294_v59 = vpop.f32.mrb[8].mxu0  ;;  %v1335_v60 = vpop.f32.mrb[16].mxu1 }
 0x7d5   :  { %v1341_v61 = vpack.c.bf16 %v1294_v59, %v1294_v59  ;;  %1449 = vperm.xlu1 %2838, %v1335_v60   ;;  %1377 = vperm.xlu0 %2837, %v1335_v60   ;;  %v1296_v62 = vpop.f32.mrb[9].mxu0  ;;  %v2708_v63 = vpop.f32.mrb[17].mxu1  ;;  %v2941_v59 = vld [vmem:[#allocation19 + $0xf0] sm:$0xff]  }
 0x7d6   :  { %v1298_v1 = vpop.f32.mrb[10].mxu0  ;;  %v1338_v2 = vpop.f32.mrb[18].mxu1  ;;  %v1342_v39 = vpack.c.bf16 %v1296_v62, %v1296_v62  ;;  %2592 = vmatprep.subr.bf16.mxu0 %v2941_v59  ;;  %v2944_v62 = vld [vmem:[#allocation19 + $0xb8] sm:$0xff]   ;;  %v1775_v63 = vld [vmem:[%s4267_s8] sm:$0xff]  ;;  %v1579_v59 = vrot.slane %v1536_v55, %v3923_v21 }
 0x7d7   :  { %v1406_v3 = vsel %vm732_vm1, %v1341_v61, 0  ;;  %v1299_v4 = vpop.f32.mrb[11].mxu0  ;;  %v2709_v5 = vpop.f32.mrb[19].mxu1  ;;  %v2943_v61 = vld [vmem:[#allocation19 + $0xf8] sm:$0xff]   ;;  %v2945_v1 = vld [vmem:[#allocation20] sm:$0xff]   ;;  %vm1789_vm9 = vcmp.eq.s32.totalorder %v1775_v63, 1 }
 0x7d8   :  { %2711 = vmatpush3.bf16.msra.mxu1 %v1406_v3  ;;  %v1478_v43 = vsel %vm732_vm1, %v1342_v39, 0  ;;  %vm1776_vm10 = vcmp.eq.s32.totalorder %v1775_v63, 0  ;;  %v1790_v2 = vsel %vm1789_vm9, 1, %v3540_v30  ;;  %v2947_v4 = vld [vmem:[#allocation20 + $0x8] sm:$0xff]   ;;  %v2949_v5 = vld [vmem:[#allocation20 + $0x10] sm:$0xff]  }
 0x7d9   :  { %2716 = vmatprep.subr.bf16.mxu1 %v3538_v0  ;;  %2839 = vset.pattern.permute.xlu0 %v3540_v30  ;;  %v1777_v3 = vsel %vm1776_vm10, 1, %v3540_v30  ;;  %v2971_v55 = vld [vmem:[#allocation20 + $0x28] sm:$0xff]  }
 0x7fe   :  { %1343 = vxpose.xlu1.b32.start.end [1/1] (short) (narrow) %v1335_v60, 8  ;;  %v2942_v60 = vld [vmem:[#allocation19 + $0xb0] sm:$0xff]  }
 0x7ff   :  { %2593 = vmatpush3.bf16.msra.mxu0 %v2942_v60  ;;  %v1538_v60 = vld [vmem:[#allocation17 + $0x2] sm:$0x3] }
 0x800   :  { %2594 = vmatprep.subr.bf16.mxu0 %v2943_v61  ;;  %v1594_v63 = vrot.slane %v1538_v60, %v3921_v19 }
 0x803   :  { %2595 = vmatpush3.bf16.msra.mxu0 %v2944_v62 }
 0x804   :  { %2742 = vmatprep.subr.bf16.mxu0 %v3538_v0 }
 0x81c   :  { %2840 = vset.pattern.permute.xlu1 %v3540_v30 }
 0x854   :  { %v1450_v6 = vpop.permute.xlu1 %1449  ;;  %v1378_v10 = vpop.permute.xlu0 %1377 }
 0x87e   :  { %v1359_v7 = vpop.trf.xlu1 }
 0x87f   :  { %v1383_v8 = vrot.slane %v1359_v7, %v3921_v19  ;;  %v1455_v9 = vrot.slane %v1359_v7, %v3923_v21 }
 0x881   :  { %v1384_v11 = vadd.f32 %v1383_v8, %v1378_v10  ;;  %v1456_v12 = vadd.f32 %v1455_v9, %v1450_v6  ;;  %v1521_v6 = vld [vmem:[#allocation14 + $0x2] sm:$0x3] }
 0x882   :  { %v1526_v7 = vrot.slane %v1521_v6, %v3921_v19  ;;  %v2948_v19 = vld [vmem:[%s4218_s15 + $0x8] sm:$0xff]  }
 0x883   :  { %v1386_v13 = vmul.f32 0.01, %v1384_v11  ;;  %v1458_v14 = vmul.f32 0.01, %v1456_v12  ;;  %vm1457_vm7 = vcmp.gt.f32.partialorder %v1456_v12, 0.0  ;;  %vm1385_vm8 = vcmp.gt.f32.partialorder %v1384_v11, 0.0 }
 0x885   :  { %v1459_v15 = vsel %vm1457_vm7, %v1456_v12, %v1458_v14  ;;  %v1387_v16 = vsel %vm1385_vm8, %v1384_v11, %v1386_v13  ;;  %v1530_v14 = vrot.slane %v1521_v6, %v3923_v21 }
 0x886   :  { %v1460_v17 = vmul.f32 %v3928_v32, %v1459_v15  ;;  %v1388_v18 = vmul.f32 %v3928_v32, %v1387_v16 }
 0x888   :  { %v1461_v20 = vsel %vm3930_vm5, %v1460_v17, -1e+30  ;;  %v1389_v22 = vsel %vm3930_vm5, %v1388_v18, -1e+30 }
 0x889   :  { %v1462_v23 = vsel %vm716_vm6, %v1461_v20, -inf  ;;  %v1390_v24 = vsel %vm716_vm6, %v1389_v22, -inf }
 0x88a   :  { %1463 = vmax.xlane.f32.xlu1 %v1462_v23  ;;  %1391 = vmax.xlane.f32.xlu0 %v1390_v24 }
 0x89b   :  { %1792 = vperm.xlu1 %2840, %v1790_v2   ;;  %v1598_v2 = vrot.slane %v1538_v60, %v3923_v21  ;;  %v2950_v21 = vld [vmem:[%s4218_s15 + $0x10] sm:$0xff]  }
 0x89c   :  { %v2975_v60 = vld [vmem:[#allocation20 + $0x38] sm:$0xff]  }
 0x917   :  { %v1464_v25 = vpop.xlane.xlu1 %1463  ;;  %v1392_v26 = vpop.xlane.xlu0 %1391 }
 0x918   :  { %v1465_v27 = vsub.f32 %v1461_v20, %v1464_v25  ;;  %v1393_v28 = vsub.f32 %v1389_v22, %v1392_v26 }
 0x91a   :  { %v1394_v29 = vmul.f32 1.442695, %v1393_v28  ;;  %v1466_v31 = vmul.f32 1.442695, %v1465_v27 }
 0x91c   :  { %2991 = vpow2.f32 %v1394_v29 }
 0x91d   :  { %2993 = vpow2.f32 %v1466_v31 }
 0x926   :  { %v2992_v32 = vpop.eup %2991 }
 0x927   :  { %v1396_v33 = vsel %vm716_vm6, %v2992_v32, 0.0  ;;  %v2994_v34 = vpop.eup %2993 }
 0x928   :  { %1397 = vadd.xlane.f32.xlu0 %v1396_v33  ;;  %v1468_v35 = vsel %vm716_vm6, %v2994_v34, 0.0 }
 0x92c   :  { %1469 = vadd.xlane.f32.xlu0 %v1468_v35 }
 0x942   :  { %1779 = vperm.xlu0 %2839, %v1777_v3  }
 0x9b5   :  { %v1398_v36 = vpop.xlane.xlu0 %1397 }
 0x9b6   :  { %2995 = vrcp.f32 %v1398_v36 }
 0x9b9   :  { %v1470_v37 = vpop.xlane.xlu0 %1469 }
 0x9ba   :  { %2997 = vrcp.f32 %v1470_v37 }
 0x9c0   :  { %v2996_v38 = vpop.eup %2995 }
 0x9c1   :  { %v1400_v40 = vmul.f32 %v2996_v38, %v2992_v32 }
 0x9c3   :  { %v1401_v41 = vpack.c.bf16 %v1400_v40, %v1400_v40 }
 0x9c4   :  { %v2998_v42 = vpop.eup %2997 }
 0x9c5   :  { %2713 = vmatmul.mubr.msk.bf16.vlgmr.msra.gmra.mrb[20].mxu1 %vm716_vm6, %v1401_v41  ;;  %v1472_v44 = vmul.f32 %v2998_v42, %v2994_v34 }
 0x9c6   :  { %2717 = vmatpush3.bf16.msra.mxu1 %v1478_v43  ;;  %2718 = vmatprep.mubr.msk.bf16.mxu1 %vm3539_vm0, %v3538_v0 }
 0x9c7   :  { %2722 = vmatprep.subr.bf16.mxu1 %v3538_v0  ;;  %v1473_v45 = vpack.c.bf16 %v1472_v44, %v1472_v44 }
 0x9cd   :  { %2719 = vmatmul.mubr.msk.bf16.vlgmr.msra.gmra.mrb[24].mxu1 %vm716_vm6, %v1473_v45 }
 0x9ce   :  { %2738 = vmatprep.mubr.msk.bf16.mxu1 %vm3539_vm0, %v3538_v0  ;;  %2723 = vmatpush3.bf16.msra.mxu1 %v2945_v1 }
 0x9cf   :  { %2724 = vmatprep.subr.bf16.mxu1 %v3538_v0 }
 0x9d2   :  { %2725 = vmatpush3.bf16.msra.mxu1 %v2947_v4 }
 0x9d3   :  { %2726 = vmatprep.subr.bf16.mxu1 %v3538_v0 }
 0x9d6   :  { %2727 = vmatpush3.bf16.msra.mxu1 %v2949_v5 }
 0x9d7   :  { %2728 = vmatprep.subr.bf16.mxu1 %v3538_v0 }
 0xa98   :  { %v1442_v8 = vpop.f32.mrb[20].mxu1 }
 0xa99   :  { %v1533_v9 = vadd.f32 %v1526_v7, %v1442_v8  ;;  %v2714_v10 = vpop.f32.mrb[21].mxu1  ;;  %v2946_v8 = vld [vmem:[%s4218_s15] sm:$0xff]  }
 0xa9a   :  { %v1445_v30 = vpop.f32.mrb[22].mxu1  ;;  %v2951_v10 = vld [vmem:[#allocation20 + $0x18] sm:$0xff]  }
 0xa9b   :  { %v1539_v11 = vrot.slane %v1533_v9, 4  ;;  %v2715_v12 = vpop.f32.mrb[23].mxu1  ;;  %v2952_v30 = vld [vmem:[%s4218_s15 + $0x18] sm:$0xff]   ;;  %2729 = vmatpush3.bf16.msra.mxu1 %v2951_v10 }
 0xa9c   :  { %2730 = vmatprep.subr.bf16.mxu1 %v3538_v0  ;;  %v2954_v12 = vld [vmem:[%s4218_s15 + $0x20] sm:$0xff]  }
 0xa9d   :  { %v1540_v13 = vadd.f32 %v1539_v11, %v1533_v9  ;;  %v2953_v11 = vld [vmem:[#allocation20 + $0x20] sm:$0xff]  }
 0xa9f   :  { %v1541_v15 = vrot.slane %v1540_v13, 2  ;;  %2731 = vmatpush3.bf16.msra.mxu1 %v2953_v11 }
 0xaa0   :  { %v1514_v16 = vpop.f32.mrb[24].mxu1  ;;  %2732 = vmatprep.subr.bf16.mxu1 %v3538_v0 }
 0xaa1   :  { %v1542_v17 = vadd.f32 %v1541_v15, %v1540_v13  ;;  %v1534_v18 = vadd.f32 %v1530_v14, %v1514_v16  ;;  %v2720_v20 = vpop.f32.mrb[25].mxu1  ;;  %v2955_v13 = vld [vmem:[#allocation20 + $0x28] sm:$0xff]   ;;  %v2957_v15 = vld [vmem:[#allocation20 + $0x30] sm:$0xff]  }
 0xaa2   :  { %v1517_v22 = vpop.f32.mrb[26].mxu1  ;;  %v2956_v14 = vld [vmem:[%s4218_s15 + $0x28] sm:$0xff]   ;;  %v2958_v16 = vld [vmem:[%s4218_s15 + $0x30] sm:$0xff]   ;;  %v1793_v20 = vpop.permute.xlu1 %1792 }
 0xaa3   :  { %v1543_v23 = vrot.slane %v1542_v17, 1  ;;  %v1545_v24 = vrot.slane %v1534_v18, 4  ;;  %v2721_v25 = vpop.f32.mrb[27].mxu1  ;;  %2733 = vmatpush3.bf16.msra.mxu1 %v2955_v13  ;;  %vm1794_vm11 = vcmp.eq.s32.totalorder %v1793_v20, 1 }
 0xaa4   :  { %2734 = vmatprep.subr.bf16.mxu1 %v3538_v0 }
 0xaa5   :  { %v1544_v26 = vadd.f32 %v1543_v23, %v1542_v17  ;;  %v1546_v27 = vadd.f32 %v1545_v24, %v1534_v18  ;;  %v2959_v17 = vld [vmem:[#allocation20 + $0x38] sm:$0xff]   ;;  %v1780_v23 = vpop.permute.xlu0 %1779 }
 0xaa6   :  { %vm1781_vm12 = vcmp.eq.s32.totalorder %v1780_v23, 1 }
 0xaa7   :  { %v1551_v28 = vmul.f32 0.125, %v1544_v26  ;;  %v1547_v29 = vrot.slane %v1546_v27, 2  ;;  %2735 = vmatpush3.bf16.msra.mxu1 %v2957_v15  ;;  %v2030_v15 = vld [vmem:[#allocation25] sm:$0x3] }
 0xaa8   :  { %2736 = vmatprep.subr.bf16.mxu1 %v3538_v0 }
 0xaa9   :  { %v1553_v31 = vsub.f32 %v1533_v9, %v1551_v28  ;;  %v1548_v32 = vadd.f32 %v1547_v29, %v1546_v27 }
 0xaab   :  { %v1555_v33 = vmul.f32 %v1553_v31, %v1553_v31  ;;  %v1549_v34 = vrot.slane %v1548_v32, 1  ;;  %v1582_v61 = vmul.f32 %v1575_v56, %v1553_v31  ;;  %2737 = vmatpush3.bf16.msra.mxu1 %v2959_v17  ;;  %v2972_v56 = vld [vmem:[%s4218_s15 + $0x28] sm:$0xff]  }
 0xaac   :  { %2762 = vmatprep.subr.bf16.mxu1 %v3538_v0 }
 0xaad   :  { %v1557_v35 = vrot.slane %v1555_v33, 4  ;;  %v1550_v36 = vadd.f32 %v1549_v34, %v1548_v32 }
 0xaaf   :  { %v1558_v37 = vadd.f32 %v1557_v35, %v1555_v33  ;;  %v1552_v38 = vmul.f32 0.125, %v1550_v36 }
 0xab1   :  { %v1559_v39 = vrot.slane %v1558_v37, 2  ;;  %v1554_v40 = vsub.f32 %v1534_v18, %v1552_v38  ;;  %v2960_v18 = vld [vmem:[%s4218_s15 + $0x38] sm:$0xff]  }
 0xab3   :  { %v1560_v41 = vadd.f32 %v1559_v39, %v1558_v37  ;;  %v1556_v42 = vmul.f32 %v1554_v40, %v1554_v40  ;;  %v1583_v1 = vmul.f32 %v1579_v59, %v1554_v40  ;;  %v2974_v59 = vld [vmem:[%s4218_s15 + $0x30] sm:$0xff]  }
 0xab5   :  { %v1561_v43 = vrot.slane %v1560_v41, 1  ;;  %v1563_v44 = vrot.slane %v1556_v42, 4 }
 0xab7   :  { %v1562_v45 = vadd.f32 %v1561_v43, %v1560_v41  ;;  %v1564_v46 = vadd.f32 %v1563_v44, %v1556_v42  ;;  %v2961_v44 = vld [vmem:[#allocation20] sm:$0xff]  }
 0xab9   :  { %v1569_v47 = vmul.f32 0.125, %v1562_v45  ;;  %v1565_v48 = vrot.slane %v1564_v46, 2  ;;  %v2962_v45 = vld [vmem:[%s4218_s15] sm:$0xff]  }
 0xabb   :  { %v1566_v49 = vadd.f32 %v1565_v48, %v1564_v46  ;;  %v1584_v50 = vadd.f32 1e-05, %v1569_v47  ;;  %v2963_v47 = vld [vmem:[#allocation20 + $0x8] sm:$0xff]  }
 0xabc   :  { %v2964_v48 = vld [vmem:[%s4218_s15 + $0x8] sm:$0xff]  }
 0xabd   :  { %v1567_v51 = vrot.slane %v1566_v49, 1  ;;  %2999 = vrsqrt.f32 %v1584_v50  ;;  %v2966_v50 = vld [vmem:[%s4218_s15 + $0x10] sm:$0xff]  }
 0xabf   :  { %v1568_v52 = vadd.f32 %v1567_v51, %v1566_v49  ;;  %v2965_v49 = vld [vmem:[#allocation20 + $0x10] sm:$0xff]   ;;  %v2967_v51 = vld [vmem:[#allocation20 + $0x18] sm:$0xff]  }
 0xac1   :  { %v1570_v53 = vmul.f32 0.125, %v1568_v52  ;;  %v2968_v52 = vld [vmem:[%s4218_s15 + $0x18] sm:$0xff]  }
 0xac3   :  { %v1585_v54 = vadd.f32 1e-05, %v1570_v53  ;;  %v2969_v53 = vld [vmem:[#allocation20 + $0x20] sm:$0xff]  }
 0xac5   :  { %3001 = vrsqrt.f32 %v1585_v54  ;;  %v2970_v54 = vld [vmem:[%s4218_s15 + $0x20] sm:$0xff]  }
 0xac7   :  { %v3000_v58 = vpop.eup %2999 }
 0xac8   :  { %v1588_v62 = vmul.f32 %v3000_v58, %v1582_v61  ;;  %v2973_v58 = vld [vmem:[#allocation20 + $0x30] sm:$0xff]   ;;  %v2976_v61 = vld [vmem:[%s4218_s15 + $0x38] sm:$0xff]   ;;  %s3543_s15 = smov [#allocation27]  }
 0xac9   :  { %s2304_s11 = sshll.u32 %s3543_s15, 4  ;;  %s2305_s11 = int_to_ptr.vmem [resolvable:$true] %s2304_s11 }
 0xaca   :  { %v1601_v5 = vadd.f32 %v1594_v63, %v1588_v62  ;;  %v4103_v63 = vld [vmem:[#allocation22] ss:$0 sm:$0xff]  ;;  %s3339_s13 = scalar_lea.vmem %s2305_s11, 32  ;;  %p3344_p9 = scmp.lt.s32.totalorder %s2305_s11, %s2305_s11 }
 0xacb   :  { %p3340_p8 = scmp.ne.s32.totalorder %s2305_s11, %s3339_s13  ;;  %p3345_p10 = scmp.lt.s32.totalorder %s3339_s13, %s3339_s13 }
 0xacc   :  { %v1603_v9 = vpack.c.bf16 %v1601_v5, %v1601_v5 }
 0xacd   :  { %p3346_p11 = por %p3345_p10, %p3344_p9 }
 0xacf   :  { %v3002_v3 = vpop.eup %3001  ;;  %p3347_p12 = pnand %p3346_p11, %p3340_p8 }
 0xad0   :  { %v1589_v4 = vmul.f32 %v3002_v3, %v1583_v1  ;;  %v2496_v1 = vld [vmem:[#allocation23] ss:$0 sm:$0xff] }
 0xad2   :  { %v1602_v6 = vadd.f32 %v1598_v2, %v1589_v4 }
 0xad4   :  { %v1604_v7 = vpack.c.bf16 %v1602_v6, %v1602_v6 }
 0xad6   :  { %1766 = vmatprep.mubr.bf16.mxu0 %v1604_v7 }
 0xad7   :  { %1767 = vmatmul.mubr.bf16.vlgmr.msra.gmra.mrb[12].mxu0 %v1603_v9 }
 0xad8   :  { %2743 = vmatpush3.bf16.msra.mxu0 %v2946_v8  ;;  %2758 = vmatprep.mubr.msk.bf16.mxu0 %vm3539_vm0, %v3538_v0 }
 0xad9   :  { %2744 = vmatprep.subr.bf16.mxu0 %v3538_v0 }
 0xadc   :  { %2745 = vmatpush3.bf16.msra.mxu0 %v2948_v19 }
 0xadd   :  { %2746 = vmatprep.subr.bf16.mxu0 %v3538_v0 }
 0xae0   :  { %2747 = vmatpush3.bf16.msra.mxu0 %v2950_v21 }
 0xae1   :  { %2748 = vmatprep.subr.bf16.mxu0 %v3538_v0 }
 0xae4   :  { %2749 = vmatpush3.bf16.msra.mxu0 %v2952_v30 }
 0xae5   :  { %2750 = vmatprep.subr.bf16.mxu0 %v3538_v0 }
 0xae8   :  { %2751 = vmatpush3.bf16.msra.mxu0 %v2954_v12 }
 0xae9   :  { %2752 = vmatprep.subr.bf16.mxu0 %v3538_v0 }
 0xaec   :  { %2753 = vmatpush3.bf16.msra.mxu0 %v2956_v14 }
 0xaed   :  { %2754 = vmatprep.subr.bf16.mxu0 %v3538_v0 }
 0xaf0   :  { %2755 = vmatpush3.bf16.msra.mxu0 %v2958_v16 }
 0xaf1   :  { %2756 = vmatprep.subr.bf16.mxu0 %v3538_v0 }
 0xaf4   :  { %2757 = vmatpush3.bf16.msra.mxu0 %v2960_v18 }
 0xaf5   :  { %2782 = vmatprep.subr.bf16.mxu0 %v3538_v0 }
 0xbaa   :  { %v2596_v22 = vpop.f32.mrb[12].mxu0 }
 0xbab   :  { %v2597_v24 = vpop.f32.mrb[13].mxu0 }
 0xbac   :  { %v2598_v25 = vadd.f32 %v2597_v24, %v2596_v22  ;;  %v2599_v26 = vpop.f32.mrb[14].mxu0 }
 0xbad   :  { %v2600_v27 = vpop.f32.mrb[15].mxu0 }
 0xbae   :  { %v4054_v28 = vadd.f32 %v2598_v25, %v3969_v57 }
 0xbb0   :  { %1774 = vst [vmem:[#allocation26] sm:$0xff] %v4054_v28  ;;  %v1795_v29 = vsel %vm1794_vm11, %v4054_v28, 0.0  ;;  %v1782_v31 = vsel %vm1781_vm12, %v4054_v28, 0.0  ;;  %v2037_v62 = vpack.c.bf16 %v4054_v28, %v4054_v28 }
 0xbb1   :  { %v1796_v32 = vrot.slane %v1795_v29, 4  ;;  %v1783_v33 = vrot.slane %v1782_v31, 4 }
 0xbb3   :  { %v1797_v34 = vadd.f32 %v1796_v32, %v1795_v29  ;;  %v1784_v35 = vadd.f32 %v1783_v33, %v1782_v31 }
 0xbb5   :  { %v1798_v36 = vrot.slane %v1797_v34, 2  ;;  %v1785_v37 = vrot.slane %v1784_v35, 2 }
 0xbb7   :  { %v1799_v38 = vadd.f32 %v1798_v36, %v1797_v34  ;;  %v1786_v39 = vadd.f32 %v1785_v37, %v1784_v35 }
 0xbb9   :  { %v1800_v40 = vrot.slane %v1799_v38, 1  ;;  %v1787_v41 = vrot.slane %v1786_v39, 1 }
 0xbbb   :  { %v1801_v42 = vadd.f32 %v1800_v40, %v1799_v38  ;;  %v1788_v57 = vadd.f32 %v1787_v41, %v1786_v39 }
 0xbbd   :  { %v1803_v43 = vsel %vm1802_vm13, %v1788_v57, %v1801_v42 }
 0xbbe   :  { %v1805_v46 = vpack.c.bf16 %v1803_v43, %v1803_v43  ;;  %1804 = vst [vmem:[#allocation27] sm:$0x3] %v1803_v43 }
 0xbc0   :  { %2739 = vmatmul.mubr.bf16.vlgmr.msra.gmra.mrb[28].mxu1 %v1805_v46  ;;  %2759 = vmatmul.mubr.bf16.vlgmr.msra.gmra.mrb[16].mxu0 %v1805_v46 }
 0xbc1   :  { %2763 = vmatpush3.bf16.msra.mxu1 %v2961_v44  ;;  %2783 = vmatpush3.bf16.msra.mxu0 %v2962_v45 }
 0xbc2   :  { %2764 = vmatprep.subr.bf16.mxu1 %v3538_v0  ;;  %2784 = vmatprep.subr.bf16.mxu0 %v3538_v0 }
 0xbc3   :  { %2778 = vmatprep.mubr.msk.bf16.mxu1 %vm3539_vm0, %v3538_v0  ;;  %2798 = vmatprep.mubr.msk.bf16.mxu0 %vm3539_vm0, %v3538_v0 }
 0xbc5   :  { %2765 = vmatpush3.bf16.msra.mxu1 %v2963_v47  ;;  %2785 = vmatpush3.bf16.msra.mxu0 %v2964_v48 }
 0xbc6   :  { %2766 = vmatprep.subr.bf16.mxu1 %v3538_v0  ;;  %2786 = vmatprep.subr.bf16.mxu0 %v3538_v0 }
 0xbc9   :  { %2767 = vmatpush3.bf16.msra.mxu1 %v2965_v49  ;;  %2787 = vmatpush3.bf16.msra.mxu0 %v2966_v50 }
 0xbca   :  { %2768 = vmatprep.subr.bf16.mxu1 %v3538_v0  ;;  %2788 = vmatprep.subr.bf16.mxu0 %v3538_v0 }
 0xbcd   :  { %2769 = vmatpush3.bf16.msra.mxu1 %v2967_v51  ;;  %2789 = vmatpush3.bf16.msra.mxu0 %v2968_v52 }
 0xbce   :  { %2770 = vmatprep.subr.bf16.mxu1 %v3538_v0  ;;  %2790 = vmatprep.subr.bf16.mxu0 %v3538_v0 }
 0xbd1   :  { %2771 = vmatpush3.bf16.msra.mxu1 %v2969_v53  ;;  %2791 = vmatpush3.bf16.msra.mxu0 %v2970_v54 }
 0xbd2   :  { %2772 = vmatprep.subr.bf16.mxu1 %v3538_v0  ;;  %2792 = vmatprep.subr.bf16.mxu0 %v3538_v0 }
 0xbd5   :  { %2773 = vmatpush3.bf16.msra.mxu1 %v2971_v55  ;;  %2793 = vmatpush3.bf16.msra.mxu0 %v2972_v56 }
 0xbd6   :  { %2774 = vmatprep.subr.bf16.mxu1 %v3538_v0  ;;  %2794 = vmatprep.subr.bf16.mxu0 %v3538_v0 }
 0xbd9   :  { %2775 = vmatpush3.bf16.msra.mxu1 %v2973_v58  ;;  %2795 = vmatpush3.bf16.msra.mxu0 %v2974_v59 }
 0xbda   :  { %2776 = vmatprep.subr.bf16.mxu1 %v3538_v0  ;;  %2796 = vmatprep.subr.bf16.mxu0 %v3538_v0 }
 0xbdd   :  { %2777 = vmatpush3.bf16.msra.mxu1 %v2975_v60  ;;  %2797 = vmatpush3.bf16.msra.mxu0 %v2976_v61 }
 0xbe0   :  { %2779 = vmatmul.mubr.bf16.vlgmr.msra.gmra.mrb[32].mxu1 %v2037_v62  ;;  %2799 = vmatmul.mubr.bf16.vlgmr.msra.gmra.mrb[20].mxu0 %v2037_v62 }
 0xc93   :  { %v1911_v2 = vpop.f32.mrb[28].mxu1  ;;  %v2022_v3 = vpop.f32.mrb[16].mxu0 }
 0xc94   :  { %v1912_v4 = vadd.f32 %v4103_v63, %v1911_v2  ;;  %v2023_v5 = vadd.f32 %v2496_v1, %v2022_v3  ;;  %v2740_v6 = vpop.f32.mrb[29].mxu1  ;;  %v2760_v7 = vpop.f32.mrb[17].mxu0 }
 0xc95   :  { %v1914_v8 = vpop.f32.mrb[30].mxu1  ;;  %v2025_v9 = vpop.f32.mrb[18].mxu0 }
 0xc96   :  { %v2268_v0 = vmul.f32 %v1912_v4, %v1912_v4  ;;  %2028 = vst [vmem:[#allocation29] sm:$0x3] %v1912_v4  ;;  %v2031_v19 = vmul.f32 0.5, %v2023_v5  ;;  %v2270_v21 = vmul.f32 1.442695, %v2023_v5  ;;  %v2741_v10 = vpop.f32.mrb[31].mxu1 }
 0xc97   :  { %2029 = vst [vmem:[#allocation30] sm:$0x3] %v2023_v5  ;;  %v2761_v30 = vpop.f32.mrb[19].mxu0  ;;  %v2267_v11 = vadd.f32 1.0, %v2023_v5 }
 0xc98   :  { %v2032_v12 = vmul.f32 1.442695, %v2031_v19  ;;  %3003 = vpow2.f32 %v2270_v21 }
 0xc99   :  { %v2269_v13 = vsub.f32 %v2267_v11, %v2268_v0 }
 0xc9a   :  { %3005 = vpow2.f32 %v2032_v12 }
 0xca2   :  { %v3004_v14 = vpop.eup %3003 }
 0xca3   :  { %v2272_v16 = vsub.f32 %v2269_v13, %v3004_v14 }
 0xca4   :  { %v3006_v17 = vpop.eup %3005 }
 0xca5   :  { %v2274_v18 = vsel %vm2273_vm14, %v2272_v16, 0.0  ;;  %v2034_v20 = vmul.f32 %v3006_v17, %v2030_v15 }
 0xca6   :  { %2275 = vadd.xlane.f32.xlu1 %v2274_v18 }
 0xca7   :  { %v2035_v22 = vadd.f32 %v2034_v20, %v1912_v4 }
 0xca9   :  { %2036 = vst [vmem:[#allocation32] sm:$0x3] %v2035_v22 }
 0xcb3   :  { %v2143_v23 = vpop.f32.mrb[32].mxu1  ;;  %v2254_v24 = vpop.f32.mrb[20].mxu0 }
 0xcb4   :  { %v2255_v25 = vadd.f32 %v2496_v1, %v2254_v24  ;;  %v2780_v26 = vpop.f32.mrb[33].mxu1  ;;  %v2800_v27 = vpop.f32.mrb[21].mxu0 }
 0xcb5   :  { %v2146_v28 = vpop.f32.mrb[34].mxu1  ;;  %v2257_v29 = vpop.f32.mrb[22].mxu0 }
 0xcb6   :  { %v2261_v31 = vmul.f32 0.5, %v2255_v25  ;;  %v2781_v32 = vpop.f32.mrb[35].mxu1  ;;  %v2801_v33 = vpop.f32.mrb[23].mxu0 }
 0xcb8   :  { %v2262_v34 = vmul.f32 1.442695, %v2261_v31 }
 0xcba   :  { %3007 = vpow2.f32 %v2262_v34 }
 0xcbb   :  { %3350 = shalt.err (!%p3347_p12)
}
 0xcbc   :  { %s3351_s5 = scalar_lea.hbm %s4223_s20, 32 }
 0xcbd   :  { %p3352_p13 = scmp.ne.s32.totalorder %s4223_s20, %s3351_s5  ;;  %p3355_p0 = scmp.lt.u32.totalorder %s3351_s5, %s4223_s20 }
 0xcbf   :  { %p3357_p1 = pnand %p3355_p0, %p3352_p13 }
 0xcc1   :  { %3360 = shalt.err (!%p3357_p1)
}
 0xcc2   :  { %2307 = dma.vmem_to_hbm [thread:$0]  %s2305_s11, 32, %s4223_s20, [#allocation28]   ;;  %v2260_v35 = vld [vmem:[%s4221_s18] sm:$0xff] }
 0xcc3   :  { %s3361_s27 = scalar_lea.vmem %s2325_s0, 32  ;;  %p3366_p3 = scmp.lt.s32.totalorder %s2325_s0, %s2325_s0 }
 0xcc4   :  { %p3362_p2 = scmp.ne.s32.totalorder %s2325_s0, %s3361_s27  ;;  %p3367_p4 = scmp.lt.s32.totalorder %s3361_s27, %s3361_s27 }
 0xcc6   :  { %p3368_p5 = por %p3367_p4, %p3366_p3 }
 0xcc8   :  { %p3369_p6 = pnand %p3368_p5, %p3362_p2 }
 0xcca   :  { %3372 = shalt.err (!%p3369_p6)
}
 0xccb   :  { %s3373_s2 = scalar_lea.hbm %s4225_s22, 32 }
 0xccc   :  { %p3374_p7 = scmp.ne.s32.totalorder %s4225_s22, %s3373_s2  ;;  %p3377_p8 = scmp.lt.u32.totalorder %s3373_s2, %s4225_s22 }
 0xcce   :  { %p3379_p9 = pnand %p3377_p8, %p3374_p7 }
 0xcd0   :  { %3382 = shalt.err (!%p3379_p9)
}
 0xcd1   :  { %2327 = dma.vmem_to_hbm [thread:$0]  %s2325_s0, 32, %s4225_s22, [#allocation31]   ;;  %v3008_v36 = vpop.eup %3007  ;;  %v2144_v37 = vadd.f32 %v4103_v63, %v2143_v23 }
 0xcd2   :  { %v2264_v38 = vmul.f32 %v3008_v36, %v2260_v35  ;;  %s3545_s12 = smov [#allocation33]   ;;  %s3546_s15 = smov [#allocation26]  }
 0xcd3   :  { %s2344_s9 = sshll.u32 %s3545_s12, 4  ;;  %s2294_s11 = sshll.u32 %s3546_s15, 4  ;;  %s4135_s9 = int_to_ptr.vmem [resolvable:$true] %s2344_s9  ;;  %s2295_s11 = int_to_ptr.vmem [resolvable:$true] %s2294_s11 }
 0xcd4   :  { %v2265_v39 = vadd.f32 %v2264_v38, %v2144_v37  ;;  %s3383_s29 = scalar_lea.vmem %s2295_s11, 128  ;;  %p3388_p11 = scmp.lt.s32.totalorder %s2295_s11, %s2295_s11 }
 0xcd5   :  { %p3384_p10 = scmp.ne.s32.totalorder %s2295_s11, %s3383_s29  ;;  %p3389_p12 = scmp.lt.s32.totalorder %s3383_s29, %s3383_s29 }
 0xcd7   :  { %p3390_p13 = por %p3389_p12, %p3388_p11 }
 0xcd9   :  { %p3391_p0 = pnand %p3390_p13, %p3384_p10 }
 0xcdb   :  { %3394 = shalt.err (!%p3391_p0)
}
 0xcdc   :  { %s3395_s13 = scalar_lea.hbm %s4222_s19, 128 }
 0xcdd   :  { %p3396_p1 = scmp.ne.s32.totalorder %s4222_s19, %s3395_s13  ;;  %p3399_p2 = scmp.lt.u32.totalorder %s3395_s13, %s4222_s19 }
 0xcdf   :  { %p3401_p3 = pnand %p3399_p2, %p3396_p1 }
 0xce1   :  { %3404 = shalt.err (!%p3401_p3)
}
 0xce2   :  { %2297 = dma.vmem_to_hbm [thread:$0]  %s2295_s11, 128, %s4222_s19, [#allocation4]   ;;  %2266 = vst [vmem:[#allocation33] sm:$0xff] %v2265_v39 }
 0xce3   :  { %s3547_s14 = smov [#allocation29]   ;;  %s3548_s17 = smov [#allocation32]  }
 0xce4   :  { %s2314_s30 = sshll.u32 %s3547_s14, 4  ;;  %s2334_s4 = sshll.u32 %s3548_s17, 4  ;;  %s2315_s30 = int_to_ptr.vmem [resolvable:$true] %s2314_s30  ;;  %s2335_s4 = int_to_ptr.vmem [resolvable:$true] %s2334_s4 }
 0xce5   :  { %s3405_s7 = scalar_lea.vmem %s4135_s9, 128  ;;  %p3410_p5 = scmp.lt.s32.totalorder %s4135_s9, %s4135_s9 }
 0xce6   :  { %p3406_p4 = scmp.ne.s32.totalorder %s4135_s9, %s3405_s7  ;;  %p3411_p6 = scmp.lt.s32.totalorder %s3405_s7, %s3405_s7 }
 0xce8   :  { %p3412_p7 = por %p3411_p6, %p3410_p5 }
 0xcea   :  { %p3413_p8 = pnand %p3412_p7, %p3406_p4 }
 0xcec   :  { %3416 = shalt.err (!%p3413_p8)
}
 0xced   :  { %s3417_s8 = scalar_lea.hbm %s4227_s24, 128 }
 0xcee   :  { %p3418_p9 = scmp.ne.s32.totalorder %s4227_s24, %s3417_s8  ;;  %p3421_p10 = scmp.lt.u32.totalorder %s3417_s8, %s4227_s24 }
 0xcf0   :  { %p3423_p11 = pnand %p3421_p10, %p3418_p9 }
 0xcf2   :  { %3426 = shalt.err (!%p3423_p11)
}
 0xcf3   :  { %2347 = dma.vmem_to_hbm [thread:$0]  %s4135_s9, 128, %s4227_s24, [#allocation34]  }
 0xcf4   :  { %s3427_s18 = scalar_lea.vmem %s2315_s30, 32  ;;  %p3432_p13 = scmp.lt.s32.totalorder %s2315_s30, %s2315_s30 }
 0xcf5   :  { %p3428_p12 = scmp.ne.s32.totalorder %s2315_s30, %s3427_s18  ;;  %p3433_p0 = scmp.lt.s32.totalorder %s3427_s18, %s3427_s18 }
 0xcf7   :  { %p3434_p1 = por %p3433_p0, %p3432_p13 }
 0xcf9   :  { %p3435_p2 = pnand %p3434_p1, %p3428_p12 }
 0xcfb   :  { %3438 = shalt.err (!%p3435_p2)
}
 0xcfc   :  { %s4268_s15 = sld [smem:[#allocation58_spill]] }
 0xd02   :  { %s3439_s11 = scalar_lea.hbm %s4268_s15, 32 }
 0xd03   :  { %p3440_p3 = scmp.ne.s32.totalorder %s4268_s15, %s3439_s11  ;;  %p3443_p4 = scmp.lt.u32.totalorder %s3439_s11, %s4268_s15 }
 0xd05   :  { %p3445_p5 = pnand %p3443_p4, %p3440_p3 }
 0xd07   :  { %3448 = shalt.err (!%p3445_p5)
}
 0xd08   :  { %2317 = dma.vmem_to_hbm [thread:$0]  %s2315_s30, 32, %s4268_s15, [#allocation28]  }
 0xd09   :  { %s3449_s21 = scalar_lea.vmem %s2335_s4, 32  ;;  %p3454_p7 = scmp.lt.s32.totalorder %s2335_s4, %s2335_s4 }
 0xd0a   :  { %p3450_p6 = scmp.ne.s32.totalorder %s2335_s4, %s3449_s21  ;;  %p3455_p8 = scmp.lt.s32.totalorder %s3449_s21, %s3449_s21 }
 0xd0c   :  { %p3456_p9 = por %p3455_p8, %p3454_p7 }
 0xd0e   :  { %p3457_p10 = pnand %p3456_p9, %p3450_p6 }
 0xd10   :  { %3460 = shalt.err (!%p3457_p10)
}
 0xd11   :  { %s4269_s26 = sld [smem:[#allocation59_spill]] }
 0xd17   :  { %s3461_s10 = scalar_lea.hbm %s4269_s26, 32 }
 0xd18   :  { %p3462_p11 = scmp.ne.s32.totalorder %s4269_s26, %s3461_s10  ;;  %p3465_p12 = scmp.lt.u32.totalorder %s3461_s10, %s4269_s26 }
 0xd1a   :  { %p3467_p13 = pnand %p3465_p12, %p3462_p11 }
 0xd1c   :  { %3470 = shalt.err (!%p3467_p13)
}
 0xd1d   :  { %2337 = dma.vmem_to_hbm [thread:$0]  %s2335_s4, 32, %s4269_s26, [#allocation31]  }
 0xd1e   :  { %s3549_s6 = smov [#allocation35]  }
 0xd1f   :  { %s2354_s8 = sshll.u32 %s3549_s6, 4  ;;  %s2355_s8 = int_to_ptr.vmem [resolvable:$true] %s2354_s8 }
 0xd20   :  { %s3471_s2 = scalar_lea.vmem %s2355_s8, 16  ;;  %s3475_s16 = scalar_lea.vmem %s2355_s8, 32 }
 0xd21   :  { %p3472_p0 = scmp.ne.s32.totalorder %s2355_s8, %s3471_s2  ;;  %p3476_p1 = scmp.lt.s32.totalorder %s2355_s8, %s2355_s8 }
 0xd22   :  { %p3477_p2 = scmp.lt.s32.totalorder %s3475_s16, %s3471_s2 }
 0xd24   :  { %p3478_p3 = por %p3477_p2, %p3476_p1 }
 0xd26   :  { %p3479_p4 = pnand %p3478_p3, %p3472_p0 }
 0xd33   :  { %v2276_v40 = vpop.xlane.xlu1 %2275 }
 0xd34   :  { %v2277_v41 = vsel %vm2273_vm14, %v2276_v40, 0.0 }
 0xd35   :  { %v2278_v42 = vrot.slane %v2277_v41, 4 }
 0xd37   :  { %v2279_v57 = vadd.f32 %v2278_v42, %v2277_v41 }
 0xd39   :  { %v2280_v43 = vrot.slane %v2279_v57, 2 }
 0xd3b   :  { %v2281_v44 = vadd.f32 %v2280_v43, %v2279_v57 }
 0xd3d   :  { %v2282_v45 = vrot.slane %v2281_v44, 1 }
 0xd3f   :  { %v2283_v46 = vadd.f32 %v2282_v45, %v2281_v44 }
 0xd41   :  { %v2285_v47 = vmul.f32 0.5, %v2283_v46 }
 0xd43   :  { %v2286_v48 = vmul.f32 -0.0005, %v2285_v47 }
 0xd45   :  { %2287 = vst [vmem:[#allocation35] sm:$0x1] %v2286_v48 }
 0xd46   :  { %3482 = shalt.err (!%p3479_p4)
}
 0xd47   :  { %s4270_s1 = sld [smem:[#allocation60_spill]] }
 0xd4d   :  { %s3483_s20 = scalar_lea.hbm %s4270_s1, 16 }
 0xd4e   :  { %p3484_p5 = scmp.ne.s32.totalorder %s4270_s1, %s3483_s20  ;;  %p3487_p6 = scmp.lt.u32.totalorder %s3483_s20, %s4270_s1 }
 0xd50   :  { %p3489_p7 = pnand %p3487_p6, %p3484_p5 }
 0xd52   :  { %3492 = shalt.err (!%p3489_p7)
}
 0xd53   :  { %2357 = dma.vmem_to_hbm [thread:$0]  %s2355_s8, 16, %s4270_s1, [#allocation34]  }
 0xd54   :  { %3509 = dma.done.wait [#allocation4], 128  }
 0xd55   :  { %3510 = vsyncadd [#allocation4], 4294967168 }
 0xd56   :  { %3511 = dma.done.wait [#allocation28], 64  }
 0xd57   :  { %3512 = vsyncadd [#allocation28], 4294967232 }
 0xd58   :  { %3513 = dma.done.wait [#allocation31], 64  }
 0xd59   :  { %3514 = vsyncadd [#allocation31], 4294967232 }
 0xd5a   :  { %3515 = dma.done.wait [#allocation34], 144  }
 0xd5b   :  { %3516 = vsyncadd [#allocation34], 4294967152 }
 0xd5c   :  { %2379 = vsyncpa [#allocation3], 1 }
 0xd5d   :  { %2380 = vsyncpa [#allocation6], 1 }
 0xd5e   :  { %2381 = vsyncpa [#allocation9], 1 }
 0xd5f   :  { %2382 = vsyncpa [#allocation12], 1 }
 0xd60   :  { %2383 = vsyncpa [#allocation15], 1 }
 0xd61   :  { %2384 = vsyncpa [#allocation18], 1 }
 0xd62   :  { %2385 = vsyncpa [#allocation21], 1 }
 0xd63   :  { %2386 = vsyncpa [#allocation24], 1 }
 0xd64   :  { %2387 = vsyncpa [#allocation4], 1 }
 0xd65   :  { %2388 = vsyncpa [#allocation28], 1 }
 0xd66   :  { %2389 = vsyncpa [#allocation31], 1 }
 0xd67   :  { %2390 = vsyncpa [#allocation34], 1 }

</bundles_post_ra>
